<compile_context>
chip_gen: v6e
topology: v6e:2x2x1
jax: 0.10.0
libtpu: 0.0.40
codegen_flags: <defaults>
</compile_context>

<pallas_src>
import jax
import jax.numpy as jnp
import numpy as np
from jax.experimental import pallas as pl
from jax.experimental.pallas import tpu as pltpu

KH = KW = 5
PAD = 2
CIN = 3
COUT = 16
EPS = 1e-5


def _pick_images_per_block(n, min_steps=8, max_bi=8):
    """Largest divisor of n (<= max_bi) that still leaves >= min_steps grid steps."""
    for bi in range(min(n, max_bi), 0, -1):
        if n % bi == 0 and n // bi >= min_steps:
            return bi
    return 1


def basic_ext_forward(x_nchw, conv_w, conv_b, bn_gamma, bn_beta):
    """x_nchw: (N, 3, H, W) f32 -> (N, 16, H//2, W//2) f32 (training-mode BatchNorm)."""
    # Conv bias cancels exactly under training-mode BN: (y+b) - mean(y+b) = y - mean(y).
    del conv_b
    N, Cin, H, W = x_nchw.shape
    assert Cin == CIN and H % 2 == 0 and W % 2 == 0
    H2, W2 = H // 2, W // 2
    Hp, Wp = H + 2 * PAD, W + 2 * PAD
    He = H2 + 2                        # padded input rows per parity
    WIN = Wp * CIN                     # raw contraction width
    WIN_P = -(-WIN // 16) * 16         # pad only to a sublane multiple (60 -> 64), not 128
    LOUT = 2 * W2 * COUT               # conv-output lanes, ordered (wp, w2, cout)
    HALF = W2 * COUT                   # pooled-output lanes, ordered (w2, cout)
    BI = _pick_images_per_block(N)     # images per grid step
    G = N // BI
    S = 2 * BI                         # stat slabs per step (image x h-parity)

    # ---------- wrapper-side layout prep (tiny one-shot XLA ops; no im2col expansion) ----------
    xh = jnp.transpose(x_nchw, (0, 2, 3, 1))                             # NHWC
    xp = jnp.pad(xh, ((0, 0), (PAD, PAD), (PAD, PAD), (0, 0)))
    xp = xp.reshape(N, Hp, WIN)
    xp = jnp.pad(xp, ((0, 0), (0, 0), (0, WIN_P - WIN)))
    xe = xp[:, 0::2, :]                                                  # (N, He, WIN_P) even padded rows
    xo = xp[:, 1::2, :]                                                  # (N, He, WIN_P) odd padded rows

    # Banded weight matrices: bmat[ki, wj*Cin+ci, wp*W2*C + w2*C + co] = conv_w[co,ci,ki,kj]
    # with kj = wj - (2*w2 + wp) when 0 <= kj < KW, else 0.
    wr = jnp.transpose(conv_w, (2, 3, 1, 0)).astype(jnp.float32)         # (KH, KW, Cin, Cout)
    kj_i = jnp.arange(KW)[:, None, None]
    wp_i = jnp.arange(2)[None, :, None]
    w2_i = jnp.arange(W2)[None, None, :]
    src_col = kj_i + wp_i + 2 * w2_i                                     # (KW, 2, W2)
    wj_i = jnp.arange(Wp)[None, :, None, None]
    mask = (wj_i == src_col[:, None, :, :]).astype(jnp.float32)          # (KW, Wp, 2, W2)
    bmat = jnp.einsum('jwpq,ijco->iwcpqo', mask, wr)                     # (KH, Wp, Cin, 2, W2, Cout)
    bmat = bmat.reshape(KH, WIN, LOUT)
    bmat = jnp.pad(bmat, ((0, 0), (0, WIN_P - WIN), (0, 0))).astype(jnp.bfloat16)

    # ---------- shared in-kernel conv: one image, one h-parity -> (H2, LOUT) f32 ----------
    def conv_slab(xe_ref, xo_ref, b_ref, img, hp):
        def ev(a):
            return xe_ref[img, a:a + H2, :].astype(jnp.bfloat16)
        def od(a):
            return xo_ref[img, a:a + H2, :].astype(jnp.bfloat16)
        if hp == 0:   # conv rows h = 2r   use padded input rows 2r .. 2r+4
            taps = (ev(0), od(0), ev(1), od(1), ev(2))
        else:         # conv rows h = 2r+1 use padded input rows 2r+1 .. 2r+5
            taps = (od(0), ev(1), od(1), ev(2), od(2))
        z = None
        for k in range(KH):
            d = jnp.dot(taps[k], b_ref[k], preferred_element_type=jnp.float32)
            z = d if z is None else z + d
        return z

    # ---------- kernel A: conv + per-slab BN partials (sum and centered M2) ----------
    def stats_kernel(xe_ref, xo_ref, b_ref, sum_ref, m2_ref):
        for img in range(BI):
            for hp in range(2):
                z = conv_slab(xe_ref, xo_ref, b_ref, img, hp)            # (H2, LOUT)
                mu = jnp.mean(z, axis=0, keepdims=True)
                d = z - mu
                s = 2 * img + hp
                sum_ref[0, s:s + 1, :] = jnp.sum(z, axis=0, keepdims=True)
                m2_ref[0, s:s + 1, :] = jnp.sum(d * d, axis=0, keepdims=True)

    # ---------- kernel B: conv (recomputed) + BN scale/shift + 2x2 max-pool + ReLU ----------
    def bn_pool_kernel(xe_ref, xo_ref, b_ref, sc_ref, sh_ref, o_ref):
        sc = sc_ref[...]                                                 # (1, LOUT)
        sh = sh_ref[...]
        for img in range(BI):
            ze = conv_slab(xe_ref, xo_ref, b_ref, img, 0) * sc + sh      # rows h = 2r
            zo = conv_slab(xe_ref, xo_ref, b_ref, img, 1) * sc + sh      # rows h = 2r+1
            zh = jnp.maximum(ze, zo)                                     # pool over h
            zw = jnp.maximum(zh[:, :HALF], zh[:, HALF:])                 # pool over w (wp halves)
            o_ref[img, :, :] = jnp.maximum(zw, 0.0)                      # ReLU (commutes with max)

    x_spec = pl.BlockSpec((BI, He, WIN_P), lambda i: (i, 0, 0))
    b_spec = pl.BlockSpec((KH, WIN_P, LOUT), lambda i: (0, 0, 0))        # constant block: fetched once
    cparams = pltpu.CompilerParams(dimension_semantics=("parallel",),
                                   vmem_limit_bytes=32 * 1024 * 1024)

    sums, m2s = pl.pallas_call(
        stats_kernel,
        out_shape=(jax.ShapeDtypeStruct((G, S, LOUT), jnp.float32),
                   jax.ShapeDtypeStruct((G, S, LOUT), jnp.float32)),
        grid=(G,),
        in_specs=[x_spec, x_spec, b_spec],
        out_specs=(pl.BlockSpec((1, S, LOUT), lambda i: (i, 0, 0)),
                   pl.BlockSpec((1, S, LOUT), lambda i: (i, 0, 0))),
        compiler_params=cparams,
    )(xe, xo, bmat)

    # ---------- combine partials (Chan parallel variance -> per-channel scale/shift) ----------
    cnt = N * H * W                                                      # values per channel
    sums4 = sums.reshape(G * S, 2, W2, COUT)
    m2s4 = m2s.reshape(G * S, 2, W2, COUT)
    mean_c = jnp.sum(sums4, axis=(0, 1, 2)) / cnt
    mu_t = sums4 / H2                                                    # per-tile means (tile count = H2)
    m2_c = jnp.sum(m2s4, axis=(0, 1, 2)) + jnp.sum(H2 * (mu_t - mean_c) ** 2, axis=(0, 1, 2))
    var_c = m2_c / cnt                                                   # biased variance, as BN uses
    scale = bn_gamma * jax.lax.rsqrt(var_c + EPS)
    shift = bn_beta - mean_c * scale
    scale_l = jnp.tile(scale, 2 * W2).reshape(1, LOUT)                   # lane order (wp, w2, co)
    shift_l = jnp.tile(shift, 2 * W2).reshape(1, LOUT)

    pooled = pl.pallas_call(
        bn_pool_kernel,
        out_shape=jax.ShapeDtypeStruct((N, H2, HALF), jnp.float32),
        grid=(G,),
        in_specs=[x_spec, x_spec, b_spec,
                  pl.BlockSpec((1, LOUT), lambda i: (0, 0)),
                  pl.BlockSpec((1, LOUT), lambda i: (0, 0))],
        out_specs=pl.BlockSpec((BI, H2, HALF), lambda i: (i, 0, 0)),
        compiler_params=cparams,
    )(xe, xo, bmat, scale_l, shift_l)

    # (N, H2, W2*Cout) -> (N, Cout, H2, W2)
    return jnp.transpose(pooled.reshape(N, H2, W2, COUT), (0, 3, 1, 2))


def _reference(x, w, b, gamma, beta):
    """Pure-JAX reference matching the PyTorch forward (training-mode BN, with conv bias)."""
    y = jax.lax.conv_general_dilated(
        x, w, window_strides=(1, 1), padding=((PAD, PAD), (PAD, PAD)),
        dimension_numbers=('NCHW', 'OIHW', 'NCHW'))
    y = y + b.reshape(1, -1, 1, 1)
    mean = jnp.mean(y, axis=(0, 2, 3), keepdims=True)
    var = jnp.mean((y - mean) ** 2, axis=(0, 2, 3), keepdims=True)
    y = (y - mean) / jnp.sqrt(var + EPS)
    y = y * gamma.reshape(1, -1, 1, 1) + beta.reshape(1, -1, 1, 1)
    y = jnp.maximum(y, 0.0)
    y = jax.lax.reduce_window(y, -jnp.inf, jax.lax.max,
                              (1, 1, 2, 2), (1, 1, 2, 2), 'VALID')
    return y


if __name__ == "__main__":
    key = jax.random.PRNGKey(0)
    k_x, k_w, k_b = jax.random.split(key, 3)

    # Small shapes consistent with the module (Conv2d(3, 16, ...)); N=16 gives BI=2 and an
    # 8-step grid in both kernels (multi-step pipelining + megacore sharding exercised).
    N, H, W = 16, 16, 16
    x = jax.random.normal(k_x, (N, CIN, H, W), dtype=jnp.float32)
    conv_w = jax.random.normal(k_w, (COUT, CIN, KH, KW), dtype=jnp.float32) * 0.1
    conv_b = jax.random.normal(k_b, (COUT,), dtype=jnp.float32) * 0.1
    bn_gamma = jnp.ones((COUT,), dtype=jnp.float32)    # PyTorch BatchNorm2d defaults
    bn_beta = jnp.zeros((COUT,), dtype=jnp.float32)

    out = jax.jit(basic_ext_forward)(x, conv_w, conv_b, bn_gamma, bn_beta)
    out = jax.block_until_ready(out)
    assert out.shape == (N, COUT, H // 2, W // 2), out.shape

    ref = jax.block_until_ready(_reference(x, conv_w, conv_b, bn_gamma, bn_beta))
    np.testing.assert_allclose(np.asarray(out), np.asarray(ref), rtol=5e-2, atol=5e-2)

    print("KERNEL_OK")
</pallas_src>

<mosaic_0001>
module attributes {stable_mosaic.version = 11 : i64} {
  func.func @stats_kernel(%arg0: i32, %arg1: memref<2x10x64xf32, #tpu.memory_space<vmem>>, %arg2: memref<2x10x64xf32, #tpu.memory_space<vmem>>, %arg3: memref<5x64x256xbf16, #tpu.memory_space<vmem>>, %arg4: memref<1x4x256xf32, #tpu.memory_space<vmem>>, %arg5: memref<1x4x256xf32, #tpu.memory_space<vmem>>) attributes {dimension_semantics = [#tpu.dimension_semantics<parallel>], iteration_bounds = array<i64: 8>, scalar_prefetch = 0 : i64, scratch_operands = 0 : i64, tpu.core_type = #tpu.core_type<tc>, window_params = [{transform_indices = @transform_0, window_bounds = array<i64: 2, 10, 64>}, {transform_indices = @transform_1, window_bounds = array<i64: 2, 10, 64>}, {pipeline_mode = #tpu.pipeline_mode<synchronous>, transform_indices = @transform_2, window_bounds = array<i64: 5, 64, 256>}, {transform_indices = @transform_3, window_bounds = array<i64: 1, 4, 256>}, {transform_indices = @transform_4, window_bounds = array<i64: 1, 4, 256>}]} {
    %c0 = arith.constant 0 : index
    %c0_0 = arith.constant 0 : index
    %c0_1 = arith.constant 0 : index
    %0 = vector.load %arg1[%c0, %c0_0, %c0_1] : memref<2x10x64xf32, #tpu.memory_space<vmem>>, vector<1x8x64xf32>
    %1 = vector.shape_cast %0 : vector<1x8x64xf32> to vector<8x64xf32>
    %2 = arith.truncf %1 : vector<8x64xf32> to vector<8x64xbf16>
    %c0_2 = arith.constant 0 : index
    %c0_3 = arith.constant 0 : index
    %c0_4 = arith.constant 0 : index
    %3 = vector.load %arg2[%c0_2, %c0_3, %c0_4] : memref<2x10x64xf32, #tpu.memory_space<vmem>>, vector<1x8x64xf32>
    %4 = vector.shape_cast %3 : vector<1x8x64xf32> to vector<8x64xf32>
    %5 = arith.truncf %4 : vector<8x64xf32> to vector<8x64xbf16>
    %c0_5 = arith.constant 0 : index
    %c1 = arith.constant 1 : index
    %c0_6 = arith.constant 0 : index
    %6 = vector.load %arg1[%c0_5, %c1, %c0_6] : memref<2x10x64xf32, #tpu.memory_space<vmem>>, vector<1x8x64xf32>
    %7 = vector.shape_cast %6 : vector<1x8x64xf32> to vector<8x64xf32>
    %8 = arith.truncf %7 : vector<8x64xf32> to vector<8x64xbf16>
    %c0_7 = arith.constant 0 : index
    %c1_8 = arith.constant 1 : index
    %c0_9 = arith.constant 0 : index
    %9 = vector.load %arg2[%c0_7, %c1_8, %c0_9] : memref<2x10x64xf32, #tpu.memory_space<vmem>>, vector<1x8x64xf32>
    %10 = vector.shape_cast %9 : vector<1x8x64xf32> to vector<8x64xf32>
    %11 = arith.truncf %10 : vector<8x64xf32> to vector<8x64xbf16>
    %c0_10 = arith.constant 0 : index
    %c2 = arith.constant 2 : index
    %c0_11 = arith.constant 0 : index
    %12 = vector.load %arg1[%c0_10, %c2, %c0_11] : memref<2x10x64xf32, #tpu.memory_space<vmem>>, vector<1x8x64xf32>
    %13 = vector.shape_cast %12 : vector<1x8x64xf32> to vector<8x64xf32>
    %14 = arith.truncf %13 : vector<8x64xf32> to vector<8x64xbf16>
    %c0_12 = arith.constant 0 : index
    %c0_13 = arith.constant 0 : index
    %c0_14 = arith.constant 0 : index
    %15 = vector.load %arg3[%c0_12, %c0_13, %c0_14] : memref<5x64x256xbf16, #tpu.memory_space<vmem>>, vector<1x64x256xbf16>
    %16 = vector.shape_cast %15 : vector<1x64x256xbf16> to vector<64x256xbf16>
    %cst = arith.constant dense<0.000000e+00> : vector<8x256xf32>
    %17 = tpu.matmul %2, %16, %cst {dimension_numbers = #tpu.dot_dimension_numbers<[1], [0], [0], [1], [0, 0, 1, 1], [], []>} : vector<8x64xbf16>, vector<64x256xbf16>, vector<8x256xf32> -> vector<8x256xf32>
    %c1_15 = arith.constant 1 : index
    %c0_16 = arith.constant 0 : index
    %c0_17 = arith.constant 0 : index
    %18 = vector.load %arg3[%c1_15, %c0_16, %c0_17] : memref<5x64x256xbf16, #tpu.memory_space<vmem>>, vector<1x64x256xbf16>
    %19 = vector.shape_cast %18 : vector<1x64x256xbf16> to vector<64x256xbf16>
    %cst_18 = arith.constant dense<0.000000e+00> : vector<8x256xf32>
    %20 = tpu.matmul %5, %19, %cst_18 {dimension_numbers = #tpu.dot_dimension_numbers<[1], [0], [0], [1], [0, 0, 1, 1], [], []>} : vector<8x64xbf16>, vector<64x256xbf16>, vector<8x256xf32> -> vector<8x256xf32>
    %21 = arith.addf %17, %20 : vector<8x256xf32>
    %c2_19 = arith.constant 2 : index
    %c0_20 = arith.constant 0 : index
    %c0_21 = arith.constant 0 : index
    %22 = vector.load %arg3[%c2_19, %c0_20, %c0_21] : memref<5x64x256xbf16, #tpu.memory_space<vmem>>, vector<1x64x256xbf16>
    %23 = vector.shape_cast %22 : vector<1x64x256xbf16> to vector<64x256xbf16>
    %cst_22 = arith.constant dense<0.000000e+00> : vector<8x256xf32>
    %24 = tpu.matmul %8, %23, %cst_22 {dimension_numbers = #tpu.dot_dimension_numbers<[1], [0], [0], [1], [0, 0, 1, 1], [], []>} : vector<8x64xbf16>, vector<64x256xbf16>, vector<8x256xf32> -> vector<8x256xf32>
    %25 = arith.addf %21, %24 : vector<8x256xf32>
    %c3 = arith.constant 3 : index
    %c0_23 = arith.constant 0 : index
    %c0_24 = arith.constant 0 : index
    %26 = vector.load %arg3[%c3, %c0_23, %c0_24] : memref<5x64x256xbf16, #tpu.memory_space<vmem>>, vector<1x64x256xbf16>
    %27 = vector.shape_cast %26 : vector<1x64x256xbf16> to vector<64x256xbf16>
    %cst_25 = arith.constant dense<0.000000e+00> : vector<8x256xf32>
    %28 = tpu.matmul %11, %27, %cst_25 {dimension_numbers = #tpu.dot_dimension_numbers<[1], [0], [0], [1], [0, 0, 1, 1], [], []>} : vector<8x64xbf16>, vector<64x256xbf16>, vector<8x256xf32> -> vector<8x256xf32>
    %29 = arith.addf %25, %28 : vector<8x256xf32>
    %c4 = arith.constant 4 : index
    %c0_26 = arith.constant 0 : index
    %c0_27 = arith.constant 0 : index
    %30 = vector.load %arg3[%c4, %c0_26, %c0_27] : memref<5x64x256xbf16, #tpu.memory_space<vmem>>, vector<1x64x256xbf16>
    %31 = vector.shape_cast %30 : vector<1x64x256xbf16> to vector<64x256xbf16>
    %cst_28 = arith.constant dense<0.000000e+00> : vector<8x256xf32>
    %32 = tpu.matmul %14, %31, %cst_28 {dimension_numbers = #tpu.dot_dimension_numbers<[1], [0], [0], [1], [0, 0, 1, 1], [], []>} : vector<8x64xbf16>, vector<64x256xbf16>, vector<8x256xf32> -> vector<8x256xf32>
    %33 = arith.addf %29, %32 : vector<8x256xf32>
    %cst_29 = arith.constant dense<0.000000e+00> : vector<256xf32>
    %34 = vector.multi_reduction <add>, %33, %cst_29 [0] : vector<8x256xf32> to vector<256xf32>
    %35 = vector.shape_cast %34 : vector<256xf32> to vector<1x256xf32>
    %cst_30 = arith.constant 8.000000e+00 : f32
    %36 = vector.broadcast %cst_30 : f32 to vector<1x256xf32>
    %37 = arith.divf %35, %36 : vector<1x256xf32>
    %38 = vector.broadcast %37 : vector<1x256xf32> to vector<8x256xf32>
    %39 = arith.subf %33, %38 : vector<8x256xf32>
    %cst_31 = arith.constant dense<0.000000e+00> : vector<256xf32>
    %40 = vector.multi_reduction <add>, %33, %cst_31 [0] : vector<8x256xf32> to vector<256xf32>
    %41 = vector.shape_cast %40 : vector<256xf32> to vector<1x256xf32>
    %c0_32 = arith.constant 0 : index
    %c0_33 = arith.constant 0 : index
    %c0_34 = arith.constant 0 : index
    %42 = vector.load %arg4[%c0_32, %c0_33, %c0_34] : memref<1x4x256xf32, #tpu.memory_space<vmem>>, vector<1x1x256xf32>
    %43 = vector.shape_cast %42 : vector<1x1x256xf32> to vector<1x256xf32>
    %44 = vector.shape_cast %41 : vector<1x256xf32> to vector<1x1x256xf32>
    tpu.vector_store %arg4[%c0_32, %c0_33, %c0_34], %44 {strides = array<i32>} : memref<1x4x256xf32, #tpu.memory_space<vmem>>, vector<1x1x256xf32>,
    %45 = arith.mulf %39, %39 : vector<8x256xf32>
    %cst_35 = arith.constant dense<0.000000e+00> : vector<256xf32>
    %46 = vector.multi_reduction <add>, %45, %cst_35 [0] : vector<8x256xf32> to vector<256xf32>
    %47 = vector.shape_cast %46 : vector<256xf32> to vector<1x256xf32>
    %c0_36 = arith.constant 0 : index
    %c0_37 = arith.constant 0 : index
    %c0_38 = arith.constant 0 : index
    %48 = vector.load %arg5[%c0_36, %c0_37, %c0_38] : memref<1x4x256xf32, #tpu.memory_space<vmem>>, vector<1x1x256xf32>
    %49 = vector.shape_cast %48 : vector<1x1x256xf32> to vector<1x256xf32>
    %50 = vector.shape_cast %47 : vector<1x256xf32> to vector<1x1x256xf32>
    tpu.vector_store %arg5[%c0_36, %c0_37, %c0_38], %50 {strides = array<i32>} : memref<1x4x256xf32, #tpu.memory_space<vmem>>, vector<1x1x256xf32>,
    %c0_39 = arith.constant 0 : index
    %c0_40 = arith.constant 0 : index
    %c0_41 = arith.constant 0 : index
    %51 = vector.load %arg2[%c0_39, %c0_40, %c0_41] : memref<2x10x64xf32, #tpu.memory_space<vmem>>, vector<1x8x64xf32>
    %52 = vector.shape_cast %51 : vector<1x8x64xf32> to vector<8x64xf32>
    %53 = arith.truncf %52 : vector<8x64xf32> to vector<8x64xbf16>
    %c0_42 = arith.constant 0 : index
    %c1_43 = arith.constant 1 : index
    %c0_44 = arith.constant 0 : index
    %54 = vector.load %arg1[%c0_42, %c1_43, %c0_44] : memref<2x10x64xf32, #tpu.memory_space<vmem>>, vector<1x8x64xf32>
    %55 = vector.shape_cast %54 : vector<1x8x64xf32> to vector<8x64xf32>
    %56 = arith.truncf %55 : vector<8x64xf32> to vector<8x64xbf16>
    %c0_45 = arith.constant 0 : index
    %c1_46 = arith.constant 1 : index
    %c0_47 = arith.constant 0 : index
    %57 = vector.load %arg2[%c0_45, %c1_46, %c0_47] : memref<2x10x64xf32, #tpu.memory_space<vmem>>, vector<1x8x64xf32>
    %58 = vector.shape_cast %57 : vector<1x8x64xf32> to vector<8x64xf32>
    %59 = arith.truncf %58 : vector<8x64xf32> to vector<8x64xbf16>
    %c0_48 = arith.constant 0 : index
    %c2_49 = arith.constant 2 : index
    %c0_50 = arith.constant 0 : index
    %60 = vector.load %arg1[%c0_48, %c2_49, %c0_50] : memref<2x10x64xf32, #tpu.memory_space<vmem>>, vector<1x8x64xf32>
    %61 = vector.shape_cast %60 : vector<1x8x64xf32> to vector<8x64xf32>
    %62 = arith.truncf %61 : vector<8x64xf32> to vector<8x64xbf16>
    %c0_51 = arith.constant 0 : index
    %c2_52 = arith.constant 2 : index
    %c0_53 = arith.constant 0 : index
    %63 = vector.load %arg2[%c0_51, %c2_52, %c0_53] : memref<2x10x64xf32, #tpu.memory_space<vmem>>, vector<1x8x64xf32>
    %64 = vector.shape_cast %63 : vector<1x8x64xf32> to vector<8x64xf32>
    %65 = arith.truncf %64 : vector<8x64xf32> to vector<8x64xbf16>
    %c0_54 = arith.constant 0 : index
    %c0_55 = arith.constant 0 : index
    %c0_56 = arith.constant 0 : index
    %66 = vector.load %arg3[%c0_54, %c0_55, %c0_56] : memref<5x64x256xbf16, #tpu.memory_space<vmem>>, vector<1x64x256xbf16>
    %67 = vector.shape_cast %66 : vector<1x64x256xbf16> to vector<64x256xbf16>
    %cst_57 = arith.constant dense<0.000000e+00> : vector<8x256xf32>
    %68 = tpu.matmul %53, %67, %cst_57 {dimension_numbers = #tpu.dot_dimension_numbers<[1], [0], [0], [1], [0, 0, 1, 1], [], []>} : vector<8x64xbf16>, vector<64x256xbf16>, vector<8x256xf32> -> vector<8x256xf32>
    %c1_58 = arith.constant 1 : index
    %c0_59 = arith.constant 0 : index
    %c0_60 = arith.constant 0 : index
    %69 = vector.load %arg3[%c1_58, %c0_59, %c0_60] : memref<5x64x256xbf16, #tpu.memory_space<vmem>>, vector<1x64x256xbf16>
    %70 = vector.shape_cast %69 : vector<1x64x256xbf16> to vector<64x256xbf16>
    %cst_61 = arith.constant dense<0.000000e+00> : vector<8x256xf32>
    %71 = tpu.matmul %56, %70, %cst_61 {dimension_numbers = #tpu.dot_dimension_numbers<[1], [0], [0], [1], [0, 0, 1, 1], [], []>} : vector<8x64xbf16>, vector<64x256xbf16>, vector<8x256xf32> -> vector<8x256xf32>
    %72 = arith.addf %68, %71 : vector<8x256xf32>
    %c2_62 = arith.constant 2 : index
    %c0_63 = arith.constant 0 : index
    %c0_64 = arith.constant 0 : index
    %73 = vector.load %arg3[%c2_62, %c0_63, %c0_64] : memref<5x64x256xbf16, #tpu.memory_space<vmem>>, vector<1x64x256xbf16>
    %74 = vector.shape_cast %73 : vector<1x64x256xbf16> to vector<64x256xbf16>
    %cst_65 = arith.constant dense<0.000000e+00> : vector<8x256xf32>
    %75 = tpu.matmul %59, %74, %cst_65 {dimension_numbers = #tpu.dot_dimension_numbers<[1], [0], [0], [1], [0, 0, 1, 1], [], []>} : vector<8x64xbf16>, vector<64x256xbf16>, vector<8x256xf32> -> vector<8x256xf32>
    %76 = arith.addf %72, %75 : vector<8x256xf32>
    %c3_66 = arith.constant 3 : index
    %c0_67 = arith.constant 0 : index
    %c0_68 = arith.constant 0 : index
    %77 = vector.load %arg3[%c3_66, %c0_67, %c0_68] : memref<5x64x256xbf16, #tpu.memory_space<vmem>>, vector<1x64x256xbf16>
    %78 = vector.shape_cast %77 : vector<1x64x256xbf16> to vector<64x256xbf16>
    %cst_69 = arith.constant dense<0.000000e+00> : vector<8x256xf32>
    %79 = tpu.matmul %62, %78, %cst_69 {dimension_numbers = #tpu.dot_dimension_numbers<[1], [0], [0], [1], [0, 0, 1, 1], [], []>} : vector<8x64xbf16>, vector<64x256xbf16>, vector<8x256xf32> -> vector<8x256xf32>
    %80 = arith.addf %76, %79 : vector<8x256xf32>
    %c4_70 = arith.constant 4 : index
    %c0_71 = arith.constant 0 : index
    %c0_72 = arith.constant 0 : index
    %81 = vector.load %arg3[%c4_70, %c0_71, %c0_72] : memref<5x64x256xbf16, #tpu.memory_space<vmem>>, vector<1x64x256xbf16>
    %82 = vector.shape_cast %81 : vector<1x64x256xbf16> to vector<64x256xbf16>
    %cst_73 = arith.constant dense<0.000000e+00> : vector<8x256xf32>
    %83 = tpu.matmul %65, %82, %cst_73 {dimension_numbers = #tpu.dot_dimension_numbers<[1], [0], [0], [1], [0, 0, 1, 1], [], []>} : vector<8x64xbf16>, vector<64x256xbf16>, vector<8x256xf32> -> vector<8x256xf32>
    %84 = arith.addf %80, %83 : vector<8x256xf32>
    %cst_74 = arith.constant dense<0.000000e+00> : vector<256xf32>
    %85 = vector.multi_reduction <add>, %84, %cst_74 [0] : vector<8x256xf32> to vector<256xf32>
    %86 = vector.shape_cast %85 : vector<256xf32> to vector<1x256xf32>
    %cst_75 = arith.constant 8.000000e+00 : f32
    %87 = vector.broadcast %cst_75 : f32 to vector<1x256xf32>
    %88 = arith.divf %86, %87 : vector<1x256xf32>
    %89 = vector.broadcast %88 : vector<1x256xf32> to vector<8x256xf32>
    %90 = arith.subf %84, %89 : vector<8x256xf32>
    %cst_76 = arith.constant dense<0.000000e+00> : vector<256xf32>
    %91 = vector.multi_reduction <add>, %84, %cst_76 [0] : vector<8x256xf32> to vector<256xf32>
    %92 = vector.shape_cast %91 : vector<256xf32> to vector<1x256xf32>
    %c0_77 = arith.constant 0 : index
    %c1_78 = arith.constant 1 : index
    %c0_79 = arith.constant 0 : index
    %93 = vector.load %arg4[%c0_77, %c1_78, %c0_79] : memref<1x4x256xf32, #tpu.memory_space<vmem>>, vector<1x1x256xf32>
    %94 = vector.shape_cast %93 : vector<1x1x256xf32> to vector<1x256xf32>
    %95 = vector.shape_cast %92 : vector<1x256xf32> to vector<1x1x256xf32>
    tpu.vector_store %arg4[%c0_77, %c1_78, %c0_79], %95 {strides = array<i32>} : memref<1x4x256xf32, #tpu.memory_space<vmem>>, vector<1x1x256xf32>,
    %96 = arith.mulf %90, %90 : vector<8x256xf32>
    %cst_80 = arith.constant dense<0.000000e+00> : vector<256xf32>
    %97 = vector.multi_reduction <add>, %96, %cst_80 [0] : vector<8x256xf32> to vector<256xf32>
    %98 = vector.shape_cast %97 : vector<256xf32> to vector<1x256xf32>
    %c0_81 = arith.constant 0 : index
    %c1_82 = arith.constant 1 : index
    %c0_83 = arith.constant 0 : index
    %99 = vector.load %arg5[%c0_81, %c1_82, %c0_83] : memref<1x4x256xf32, #tpu.memory_space<vmem>>, vector<1x1x256xf32>
    %100 = vector.shape_cast %99 : vector<1x1x256xf32> to vector<1x256xf32>
    %101 = vector.shape_cast %98 : vector<1x256xf32> to vector<1x1x256xf32>
    tpu.vector_store %arg5[%c0_81, %c1_82, %c0_83], %101 {strides = array<i32>} : memref<1x4x256xf32, #tpu.memory_space<vmem>>, vector<1x1x256xf32>,
    %c1_84 = arith.constant 1 : index
    %c0_85 = arith.constant 0 : index
    %c0_86 = arith.constant 0 : index
    %102 = vector.load %arg1[%c1_84, %c0_85, %c0_86] : memref<2x10x64xf32, #tpu.memory_space<vmem>>, vector<1x8x64xf32>
    %103 = vector.shape_cast %102 : vector<1x8x64xf32> to vector<8x64xf32>
    %104 = arith.truncf %103 : vector<8x64xf32> to vector<8x64xbf16>
    %c1_87 = arith.constant 1 : index
    %c0_88 = arith.constant 0 : index
    %c0_89 = arith.constant 0 : index
    %105 = vector.load %arg2[%c1_87, %c0_88, %c0_89] : memref<2x10x64xf32, #tpu.memory_space<vmem>>, vector<1x8x64xf32>
    %106 = vector.shape_cast %105 : vector<1x8x64xf32> to vector<8x64xf32>
    %107 = arith.truncf %106 : vector<8x64xf32> to vector<8x64xbf16>
    %c1_90 = arith.constant 1 : index
    %c1_91 = arith.constant 1 : index
    %c0_92 = arith.constant 0 : index
    %108 = vector.load %arg1[%c1_90, %c1_91, %c0_92] : memref<2x10x64xf32, #tpu.memory_space<vmem>>, vector<1x8x64xf32>
    %109 = vector.shape_cast %108 : vector<1x8x64xf32> to vector<8x64xf32>
    %110 = arith.truncf %109 : vector<8x64xf32> to vector<8x64xbf16>
    %c1_93 = arith.constant 1 : index
    %c1_94 = arith.constant 1 : index
    %c0_95 = arith.constant 0 : index
    %111 = vector.load %arg2[%c1_93, %c1_94, %c0_95] : memref<2x10x64xf32, #tpu.memory_space<vmem>>, vector<1x8x64xf32>
    %112 = vector.shape_cast %111 : vector<1x8x64xf32> to vector<8x64xf32>
    %113 = arith.truncf %112 : vector<8x64xf32> to vector<8x64xbf16>
    %c1_96 = arith.constant 1 : index
    %c2_97 = arith.constant 2 : index
    %c0_98 = arith.constant 0 : index
    %114 = vector.load %arg1[%c1_96, %c2_97, %c0_98] : memref<2x10x64xf32, #tpu.memory_space<vmem>>, vector<1x8x64xf32>
    %115 = vector.shape_cast %114 : vector<1x8x64xf32> to vector<8x64xf32>
    %116 = arith.truncf %115 : vector<8x64xf32> to vector<8x64xbf16>
    %c0_99 = arith.constant 0 : index
    %c0_100 = arith.constant 0 : index
    %c0_101 = arith.constant 0 : index
    %117 = vector.load %arg3[%c0_99, %c0_100, %c0_101] : memref<5x64x256xbf16, #tpu.memory_space<vmem>>, vector<1x64x256xbf16>
    %118 = vector.shape_cast %117 : vector<1x64x256xbf16> to vector<64x256xbf16>
    %cst_102 = arith.constant dense<0.000000e+00> : vector<8x256xf32>
    %119 = tpu.matmul %104, %118, %cst_102 {dimension_numbers = #tpu.dot_dimension_numbers<[1], [0], [0], [1], [0, 0, 1, 1], [], []>} : vector<8x64xbf16>, vector<64x256xbf16>, vector<8x256xf32> -> vector<8x256xf32>
    %c1_103 = arith.constant 1 : index
    %c0_104 = arith.constant 0 : index
    %c0_105 = arith.constant 0 : index
    %120 = vector.load %arg3[%c1_103, %c0_104, %c0_105] : memref<5x64x256xbf16, #tpu.memory_space<vmem>>, vector<1x64x256xbf16>
    %121 = vector.shape_cast %120 : vector<1x64x256xbf16> to vector<64x256xbf16>
    %cst_106 = arith.constant dense<0.000000e+00> : vector<8x256xf32>
    %122 = tpu.matmul %107, %121, %cst_106 {dimension_numbers = #tpu.dot_dimension_numbers<[1], [0], [0], [1], [0, 0, 1, 1], [], []>} : vector<8x64xbf16>, vector<64x256xbf16>, vector<8x256xf32> -> vector<8x256xf32>
    %123 = arith.addf %119, %122 : vector<8x256xf32>
    %c2_107 = arith.constant 2 : index
    %c0_108 = arith.constant 0 : index
    %c0_109 = arith.constant 0 : index
    %124 = vector.load %arg3[%c2_107, %c0_108, %c0_109] : memref<5x64x256xbf16, #tpu.memory_space<vmem>>, vector<1x64x256xbf16>
    %125 = vector.shape_cast %124 : vector<1x64x256xbf16> to vector<64x256xbf16>
    %cst_110 = arith.constant dense<0.000000e+00> : vector<8x256xf32>
    %126 = tpu.matmul %110, %125, %cst_110 {dimension_numbers = #tpu.dot_dimension_numbers<[1], [0], [0], [1], [0, 0, 1, 1], [], []>} : vector<8x64xbf16>, vector<64x256xbf16>, vector<8x256xf32> -> vector<8x256xf32>
    %127 = arith.addf %123, %126 : vector<8x256xf32>
    %c3_111 = arith.constant 3 : index
    %c0_112 = arith.constant 0 : index
    %c0_113 = arith.constant 0 : index
    %128 = vector.load %arg3[%c3_111, %c0_112, %c0_113] : memref<5x64x256xbf16, #tpu.memory_space<vmem>>, vector<1x64x256xbf16>
    %129 = vector.shape_cast %128 : vector<1x64x256xbf16> to vector<64x256xbf16>
    %cst_114 = arith.constant dense<0.000000e+00> : vector<8x256xf32>
    %130 = tpu.matmul %113, %129, %cst_114 {dimension_numbers = #tpu.dot_dimension_numbers<[1], [0], [0], [1], [0, 0, 1, 1], [], []>} : vector<8x64xbf16>, vector<64x256xbf16>, vector<8x256xf32> -> vector<8x256xf32>
    %131 = arith.addf %127, %130 : vector<8x256xf32>
    %c4_115 = arith.constant 4 : index
    %c0_116 = arith.constant 0 : index
    %c0_117 = arith.constant 0 : index
    %132 = vector.load %arg3[%c4_115, %c0_116, %c0_117] : memref<5x64x256xbf16, #tpu.memory_space<vmem>>, vector<1x64x256xbf16>
    %133 = vector.shape_cast %132 : vector<1x64x256xbf16> to vector<64x256xbf16>
    %cst_118 = arith.constant dense<0.000000e+00> : vector<8x256xf32>
    %134 = tpu.matmul %116, %133, %cst_118 {dimension_numbers = #tpu.dot_dimension_numbers<[1], [0], [0], [1], [0, 0, 1, 1], [], []>} : vector<8x64xbf16>, vector<64x256xbf16>, vector<8x256xf32> -> vector<8x256xf32>
    %135 = arith.addf %131, %134 : vector<8x256xf32>
    %cst_119 = arith.constant dense<0.000000e+00> : vector<256xf32>
    %136 = vector.multi_reduction <add>, %135, %cst_119 [0] : vector<8x256xf32> to vector<256xf32>
    %137 = vector.shape_cast %136 : vector<256xf32> to vector<1x256xf32>
    %cst_120 = arith.constant 8.000000e+00 : f32
    %138 = vector.broadcast %cst_120 : f32 to vector<1x256xf32>
    %139 = arith.divf %137, %138 : vector<1x256xf32>
    %140 = vector.broadcast %139 : vector<1x256xf32> to vector<8x256xf32>
    %141 = arith.subf %135, %140 : vector<8x256xf32>
    %cst_121 = arith.constant dense<0.000000e+00> : vector<256xf32>
    %142 = vector.multi_reduction <add>, %135, %cst_121 [0] : vector<8x256xf32> to vector<256xf32>
    %143 = vector.shape_cast %142 : vector<256xf32> to vector<1x256xf32>
    %c0_122 = arith.constant 0 : index
    %c2_123 = arith.constant 2 : index
    %c0_124 = arith.constant 0 : index
    %144 = vector.load %arg4[%c0_122, %c2_123, %c0_124] : memref<1x4x256xf32, #tpu.memory_space<vmem>>, vector<1x1x256xf32>
    %145 = vector.shape_cast %144 : vector<1x1x256xf32> to vector<1x256xf32>
    %146 = vector.shape_cast %143 : vector<1x256xf32> to vector<1x1x256xf32>
    tpu.vector_store %arg4[%c0_122, %c2_123, %c0_124], %146 {strides = array<i32>} : memref<1x4x256xf32, #tpu.memory_space<vmem>>, vector<1x1x256xf32>,
    %147 = arith.mulf %141, %141 : vector<8x256xf32>
    %cst_125 = arith.constant dense<0.000000e+00> : vector<256xf32>
    %148 = vector.multi_reduction <add>, %147, %cst_125 [0] : vector<8x256xf32> to vector<256xf32>
    %149 = vector.shape_cast %148 : vector<256xf32> to vector<1x256xf32>
    %c0_126 = arith.constant 0 : index
    %c2_127 = arith.constant 2 : index
    %c0_128 = arith.constant 0 : index
    %150 = vector.load %arg5[%c0_126, %c2_127, %c0_128] : memref<1x4x256xf32, #tpu.memory_space<vmem>>, vector<1x1x256xf32>
    %151 = vector.shape_cast %150 : vector<1x1x256xf32> to vector<1x256xf32>
    %152 = vector.shape_cast %149 : vector<1x256xf32> to vector<1x1x256xf32>
    tpu.vector_store %arg5[%c0_126, %c2_127, %c0_128], %152 {strides = array<i32>} : memref<1x4x256xf32, #tpu.memory_space<vmem>>, vector<1x1x256xf32>,
    %c1_129 = arith.constant 1 : index
    %c0_130 = arith.constant 0 : index
    %c0_131 = arith.constant 0 : index
    %153 = vector.load %arg2[%c1_129, %c0_130, %c0_131] : memref<2x10x64xf32, #tpu.memory_space<vmem>>, vector<1x8x64xf32>
    %154 = vector.shape_cast %153 : vector<1x8x64xf32> to vector<8x64xf32>
    %155 = arith.truncf %154 : vector<8x64xf32> to vector<8x64xbf16>
    %c1_132 = arith.constant 1 : index
    %c1_133 = arith.constant 1 : index
    %c0_134 = arith.constant 0 : index
    %156 = vector.load %arg1[%c1_132, %c1_133, %c0_134] : memref<2x10x64xf32, #tpu.memory_space<vmem>>, vector<1x8x64xf32>
    %157 = vector.shape_cast %156 : vector<1x8x64xf32> to vector<8x64xf32>
    %158 = arith.truncf %157 : vector<8x64xf32> to vector<8x64xbf16>
    %c1_135 = arith.constant 1 : index
    %c1_136 = arith.constant 1 : index
    %c0_137 = arith.constant 0 : index
    %159 = vector.load %arg2[%c1_135, %c1_136, %c0_137] : memref<2x10x64xf32, #tpu.memory_space<vmem>>, vector<1x8x64xf32>
    %160 = vector.shape_cast %159 : vector<1x8x64xf32> to vector<8x64xf32>
    %161 = arith.truncf %160 : vector<8x64xf32> to vector<8x64xbf16>
    %c1_138 = arith.constant 1 : index
    %c2_139 = arith.constant 2 : index
    %c0_140 = arith.constant 0 : index
    %162 = vector.load %arg1[%c1_138, %c2_139, %c0_140] : memref<2x10x64xf32, #tpu.memory_space<vmem>>, vector<1x8x64xf32>
    %163 = vector.shape_cast %162 : vector<1x8x64xf32> to vector<8x64xf32>
    %164 = arith.truncf %163 : vector<8x64xf32> to vector<8x64xbf16>
    %c1_141 = arith.constant 1 : index
    %c2_142 = arith.constant 2 : index
    %c0_143 = arith.constant 0 : index
    %165 = vector.load %arg2[%c1_141, %c2_142, %c0_143] : memref<2x10x64xf32, #tpu.memory_space<vmem>>, vector<1x8x64xf32>
    %166 = vector.shape_cast %165 : vector<1x8x64xf32> to vector<8x64xf32>
    %167 = arith.truncf %166 : vector<8x64xf32> to vector<8x64xbf16>
    %c0_144 = arith.constant 0 : index
    %c0_145 = arith.constant 0 : index
    %c0_146 = arith.constant 0 : index
    %168 = vector.load %arg3[%c0_144, %c0_145, %c0_146] : memref<5x64x256xbf16, #tpu.memory_space<vmem>>, vector<1x64x256xbf16>
    %169 = vector.shape_cast %168 : vector<1x64x256xbf16> to vector<64x256xbf16>
    %cst_147 = arith.constant dense<0.000000e+00> : vector<8x256xf32>
    %170 = tpu.matmul %155, %169, %cst_147 {dimension_numbers = #tpu.dot_dimension_numbers<[1], [0], [0], [1], [0, 0, 1, 1], [], []>} : vector<8x64xbf16>, vector<64x256xbf16>, vector<8x256xf32> -> vector<8x256xf32>
    %c1_148 = arith.constant 1 : index
    %c0_149 = arith.constant 0 : index
    %c0_150 = arith.constant 0 : index
    %171 = vector.load %arg3[%c1_148, %c0_149, %c0_150] : memref<5x64x256xbf16, #tpu.memory_space<vmem>>, vector<1x64x256xbf16>
    %172 = vector.shape_cast %171 : vector<1x64x256xbf16> to vector<64x256xbf16>
    %cst_151 = arith.constant dense<0.000000e+00> : vector<8x256xf32>
    %173 = tpu.matmul %158, %172, %cst_151 {dimension_numbers = #tpu.dot_dimension_numbers<[1], [0], [0], [1], [0, 0, 1, 1], [], []>} : vector<8x64xbf16>, vector<64x256xbf16>, vector<8x256xf32> -> vector<8x256xf32>
    %174 = arith.addf %170, %173 : vector<8x256xf32>
    %c2_152 = arith.constant 2 : index
    %c0_153 = arith.constant 0 : index
    %c0_154 = arith.constant 0 : index
    %175 = vector.load %arg3[%c2_152, %c0_153, %c0_154] : memref<5x64x256xbf16, #tpu.memory_space<vmem>>, vector<1x64x256xbf16>
    %176 = vector.shape_cast %175 : vector<1x64x256xbf16> to vector<64x256xbf16>
    %cst_155 = arith.constant dense<0.000000e+00> : vector<8x256xf32>
    %177 = tpu.matmul %161, %176, %cst_155 {dimension_numbers = #tpu.dot_dimension_numbers<[1], [0], [0], [1], [0, 0, 1, 1], [], []>} : vector<8x64xbf16>, vector<64x256xbf16>, vector<8x256xf32> -> vector<8x256xf32>
    %178 = arith.addf %174, %177 : vector<8x256xf32>
    %c3_156 = arith.constant 3 : index
    %c0_157 = arith.constant 0 : index
    %c0_158 = arith.constant 0 : index
    %179 = vector.load %arg3[%c3_156, %c0_157, %c0_158] : memref<5x64x256xbf16, #tpu.memory_space<vmem>>, vector<1x64x256xbf16>
    %180 = vector.shape_cast %179 : vector<1x64x256xbf16> to vector<64x256xbf16>
    %cst_159 = arith.constant dense<0.000000e+00> : vector<8x256xf32>
    %181 = tpu.matmul %164, %180, %cst_159 {dimension_numbers = #tpu.dot_dimension_numbers<[1], [0], [0], [1], [0, 0, 1, 1], [], []>} : vector<8x64xbf16>, vector<64x256xbf16>, vector<8x256xf32> -> vector<8x256xf32>
    %182 = arith.addf %178, %181 : vector<8x256xf32>
    %c4_160 = arith.constant 4 : index
    %c0_161 = arith.constant 0 : index
    %c0_162 = arith.constant 0 : index
    %183 = vector.load %arg3[%c4_160, %c0_161, %c0_162] : memref<5x64x256xbf16, #tpu.memory_space<vmem>>, vector<1x64x256xbf16>
    %184 = vector.shape_cast %183 : vector<1x64x256xbf16> to vector<64x256xbf16>
    %cst_163 = arith.constant dense<0.000000e+00> : vector<8x256xf32>
    %185 = tpu.matmul %167, %184, %cst_163 {dimension_numbers = #tpu.dot_dimension_numbers<[1], [0], [0], [1], [0, 0, 1, 1], [], []>} : vector<8x64xbf16>, vector<64x256xbf16>, vector<8x256xf32> -> vector<8x256xf32>
    %186 = arith.addf %182, %185 : vector<8x256xf32>
    %cst_164 = arith.constant dense<0.000000e+00> : vector<256xf32>
    %187 = vector.multi_reduction <add>, %186, %cst_164 [0] : vector<8x256xf32> to vector<256xf32>
    %188 = vector.shape_cast %187 : vector<256xf32> to vector<1x256xf32>
    %cst_165 = arith.constant 8.000000e+00 : f32
    %189 = vector.broadcast %cst_165 : f32 to vector<1x256xf32>
    %190 = arith.divf %188, %189 : vector<1x256xf32>
    %191 = vector.broadcast %190 : vector<1x256xf32> to vector<8x256xf32>
    %192 = arith.subf %186, %191 : vector<8x256xf32>
    %cst_166 = arith.constant dense<0.000000e+00> : vector<256xf32>
    %193 = vector.multi_reduction <add>, %186, %cst_166 [0] : vector<8x256xf32> to vector<256xf32>
    %194 = vector.shape_cast %193 : vector<256xf32> to vector<1x256xf32>
    %c0_167 = arith.constant 0 : index
    %c3_168 = arith.constant 3 : index
    %c0_169 = arith.constant 0 : index
    %195 = vector.load %arg4[%c0_167, %c3_168, %c0_169] : memref<1x4x256xf32, #tpu.memory_space<vmem>>, vector<1x1x256xf32>
    %196 = vector.shape_cast %195 : vector<1x1x256xf32> to vector<1x256xf32>
    %197 = vector.shape_cast %194 : vector<1x256xf32> to vector<1x1x256xf32>
    tpu.vector_store %arg4[%c0_167, %c3_168, %c0_169], %197 {strides = array<i32>} : memref<1x4x256xf32, #tpu.memory_space<vmem>>, vector<1x1x256xf32>,
    %198 = arith.mulf %192, %192 : vector<8x256xf32>
    %cst_170 = arith.constant dense<0.000000e+00> : vector<256xf32>
    %199 = vector.multi_reduction <add>, %198, %cst_170 [0] : vector<8x256xf32> to vector<256xf32>
    %200 = vector.shape_cast %199 : vector<256xf32> to vector<1x256xf32>
    %c0_171 = arith.constant 0 : index
    %c3_172 = arith.constant 3 : index
    %c0_173 = arith.constant 0 : index
    %201 = vector.load %arg5[%c0_171, %c3_172, %c0_173] : memref<1x4x256xf32, #tpu.memory_space<vmem>>, vector<1x1x256xf32>
    %202 = vector.shape_cast %201 : vector<1x1x256xf32> to vector<1x256xf32>
    %203 = vector.shape_cast %200 : vector<1x256xf32> to vector<1x1x256xf32>
    tpu.vector_store %arg5[%c0_171, %c3_172, %c0_173], %203 {strides = array<i32>} : memref<1x4x256xf32, #tpu.memory_space<vmem>>, vector<1x1x256xf32>,
    return
  }
  func.func @transform_0(%arg0: i32) -> (i32, i32, i32) {
    %c0_i32 = arith.constant 0 : i32
    %c0_i32_0 = arith.constant 0 : i32
    %c0_i32_1 = arith.constant 0 : i32
    return %arg0, %c0_i32, %c0_i32_0 : i32, i32, i32
  }
  func.func @transform_1(%arg0: i32) -> (i32, i32, i32) {
    %c0_i32 = arith.constant 0 : i32
    %c0_i32_0 = arith.constant 0 : i32
    %c0_i32_1 = arith.constant 0 : i32
    return %arg0, %c0_i32, %c0_i32_0 : i32, i32, i32
  }
  func.func @transform_2(%arg0: i32) -> (i32, i32, i32) {
    %c0_i32 = arith.constant 0 : i32
    %c0_i32_0 = arith.constant 0 : i32
    %c0_i32_1 = arith.constant 0 : i32
    %c0_i32_2 = arith.constant 0 : i32
    return %c0_i32, %c0_i32_0, %c0_i32_1 : i32, i32, i32
  }
  func.func @transform_3(%arg0: i32) -> (i32, i32, i32) {
    %c0_i32 = arith.constant 0 : i32
    %c0_i32_0 = arith.constant 0 : i32
    %c0_i32_1 = arith.constant 0 : i32
    return %arg0, %c0_i32, %c0_i32_0 : i32, i32, i32
  }
  func.func @transform_4(%arg0: i32) -> (i32, i32, i32) {
    %c0_i32 = arith.constant 0 : i32
    %c0_i32_0 = arith.constant 0 : i32
    %c0_i32_1 = arith.constant 0 : i32
    return %arg0, %c0_i32, %c0_i32_0 : i32, i32, i32
  }
}

module attributes {stable_mosaic.version = 11 : i64} {
  func.func @bn_pool_kernel(%arg0: i32, %arg1: memref<2x10x64xf32, #tpu.memory_space<vmem>>, %arg2: memref<2x10x64xf32, #tpu.memory_space<vmem>>, %arg3: memref<5x64x256xbf16, #tpu.memory_space<vmem>>, %arg4: memref<1x256xf32, #tpu.memory_space<vmem>>, %arg5: memref<1x256xf32, #tpu.memory_space<vmem>>, %arg6: memref<2x8x128xf32, #tpu.memory_space<vmem>>) attributes {dimension_semantics = [#tpu.dimension_semantics<parallel>], iteration_bounds = array<i64: 8>, scalar_prefetch = 0 : i64, scratch_operands = 0 : i64, tpu.core_type = #tpu.core_type<tc>, window_params = [{transform_indices = @transform_0, window_bounds = array<i64: 2, 10, 64>}, {transform_indices = @transform_1, window_bounds = array<i64: 2, 10, 64>}, {pipeline_mode = #tpu.pipeline_mode<synchronous>, transform_indices = @transform_2, window_bounds = array<i64: 5, 64, 256>}, {pipeline_mode = #tpu.pipeline_mode<synchronous>, transform_indices = @transform_3, window_bounds = array<i64: 1, 256>}, {pipeline_mode = #tpu.pipeline_mode<synchronous>, transform_indices = @transform_4, window_bounds = array<i64: 1, 256>}, {transform_indices = @transform_5, window_bounds = array<i64: 2, 8, 128>}]} {
    %c0 = arith.constant 0 : index
    %c0_0 = arith.constant 0 : index
    %0 = vector.load %arg4[%c0, %c0_0] : memref<1x256xf32, #tpu.memory_space<vmem>>, vector<1x256xf32>
    %c0_1 = arith.constant 0 : index
    %c0_2 = arith.constant 0 : index
    %1 = vector.load %arg5[%c0_1, %c0_2] : memref<1x256xf32, #tpu.memory_space<vmem>>, vector<1x256xf32>
    %c0_3 = arith.constant 0 : index
    %c0_4 = arith.constant 0 : index
    %c0_5 = arith.constant 0 : index
    %2 = vector.load %arg1[%c0_3, %c0_4, %c0_5] : memref<2x10x64xf32, #tpu.memory_space<vmem>>, vector<1x8x64xf32>
    %3 = vector.shape_cast %2 : vector<1x8x64xf32> to vector<8x64xf32>
    %4 = arith.truncf %3 : vector<8x64xf32> to vector<8x64xbf16>
    %c0_6 = arith.constant 0 : index
    %c0_7 = arith.constant 0 : index
    %c0_8 = arith.constant 0 : index
    %5 = vector.load %arg2[%c0_6, %c0_7, %c0_8] : memref<2x10x64xf32, #tpu.memory_space<vmem>>, vector<1x8x64xf32>
    %6 = vector.shape_cast %5 : vector<1x8x64xf32> to vector<8x64xf32>
    %7 = arith.truncf %6 : vector<8x64xf32> to vector<8x64xbf16>
    %c0_9 = arith.constant 0 : index
    %c1 = arith.constant 1 : index
    %c0_10 = arith.constant 0 : index
    %8 = vector.load %arg1[%c0_9, %c1, %c0_10] : memref<2x10x64xf32, #tpu.memory_space<vmem>>, vector<1x8x64xf32>
    %9 = vector.shape_cast %8 : vector<1x8x64xf32> to vector<8x64xf32>
    %10 = arith.truncf %9 : vector<8x64xf32> to vector<8x64xbf16>
    %c0_11 = arith.constant 0 : index
    %c1_12 = arith.constant 1 : index
    %c0_13 = arith.constant 0 : index
    %11 = vector.load %arg2[%c0_11, %c1_12, %c0_13] : memref<2x10x64xf32, #tpu.memory_space<vmem>>, vector<1x8x64xf32>
    %12 = vector.shape_cast %11 : vector<1x8x64xf32> to vector<8x64xf32>
    %13 = arith.truncf %12 : vector<8x64xf32> to vector<8x64xbf16>
    %c0_14 = arith.constant 0 : index
    %c2 = arith.constant 2 : index
    %c0_15 = arith.constant 0 : index
    %14 = vector.load %arg1[%c0_14, %c2, %c0_15] : memref<2x10x64xf32, #tpu.memory_space<vmem>>, vector<1x8x64xf32>
    %15 = vector.shape_cast %14 : vector<1x8x64xf32> to vector<8x64xf32>
    %16 = arith.truncf %15 : vector<8x64xf32> to vector<8x64xbf16>
    %c0_16 = arith.constant 0 : index
    %c0_17 = arith.constant 0 : index
    %c0_18 = arith.constant 0 : index
    %17 = vector.load %arg3[%c0_16, %c0_17, %c0_18] : memref<5x64x256xbf16, #tpu.memory_space<vmem>>, vector<1x64x256xbf16>
    %18 = vector.shape_cast %17 : vector<1x64x256xbf16> to vector<64x256xbf16>
    %cst = arith.constant dense<0.000000e+00> : vector<8x256xf32>
    %19 = tpu.matmul %4, %18, %cst {dimension_numbers = #tpu.dot_dimension_numbers<[1], [0], [0], [1], [0, 0, 1, 1], [], []>} : vector<8x64xbf16>, vector<64x256xbf16>, vector<8x256xf32> -> vector<8x256xf32>
    %c1_19 = arith.constant 1 : index
    %c0_20 = arith.constant 0 : index
    %c0_21 = arith.constant 0 : index
    %20 = vector.load %arg3[%c1_19, %c0_20, %c0_21] : memref<5x64x256xbf16, #tpu.memory_space<vmem>>, vector<1x64x256xbf16>
    %21 = vector.shape_cast %20 : vector<1x64x256xbf16> to vector<64x256xbf16>
    %cst_22 = arith.constant dense<0.000000e+00> : vector<8x256xf32>
    %22 = tpu.matmul %7, %21, %cst_22 {dimension_numbers = #tpu.dot_dimension_numbers<[1], [0], [0], [1], [0, 0, 1, 1], [], []>} : vector<8x64xbf16>, vector<64x256xbf16>, vector<8x256xf32> -> vector<8x256xf32>
    %23 = arith.addf %19, %22 : vector<8x256xf32>
    %c2_23 = arith.constant 2 : index
    %c0_24 = arith.constant 0 : index
    %c0_25 = arith.constant 0 : index
    %24 = vector.load %arg3[%c2_23, %c0_24, %c0_25] : memref<5x64x256xbf16, #tpu.memory_space<vmem>>, vector<1x64x256xbf16>
    %25 = vector.shape_cast %24 : vector<1x64x256xbf16> to vector<64x256xbf16>
    %cst_26 = arith.constant dense<0.000000e+00> : vector<8x256xf32>
    %26 = tpu.matmul %10, %25, %cst_26 {dimension_numbers = #tpu.dot_dimension_numbers<[1], [0], [0], [1], [0, 0, 1, 1], [], []>} : vector<8x64xbf16>, vector<64x256xbf16>, vector<8x256xf32> -> vector<8x256xf32>
    %27 = arith.addf %23, %26 : vector<8x256xf32>
    %c3 = arith.constant 3 : index
    %c0_27 = arith.constant 0 : index
    %c0_28 = arith.constant 0 : index
    %28 = vector.load %arg3[%c3, %c0_27, %c0_28] : memref<5x64x256xbf16, #tpu.memory_space<vmem>>, vector<1x64x256xbf16>
    %29 = vector.shape_cast %28 : vector<1x64x256xbf16> to vector<64x256xbf16>
    %cst_29 = arith.constant dense<0.000000e+00> : vector<8x256xf32>
    %30 = tpu.matmul %13, %29, %cst_29 {dimension_numbers = #tpu.dot_dimension_numbers<[1], [0], [0], [1], [0, 0, 1, 1], [], []>} : vector<8x64xbf16>, vector<64x256xbf16>, vector<8x256xf32> -> vector<8x256xf32>
    %31 = arith.addf %27, %30 : vector<8x256xf32>
    %c4 = arith.constant 4 : index
    %c0_30 = arith.constant 0 : index
    %c0_31 = arith.constant 0 : index
    %32 = vector.load %arg3[%c4, %c0_30, %c0_31] : memref<5x64x256xbf16, #tpu.memory_space<vmem>>, vector<1x64x256xbf16>
    %33 = vector.shape_cast %32 : vector<1x64x256xbf16> to vector<64x256xbf16>
    %cst_32 = arith.constant dense<0.000000e+00> : vector<8x256xf32>
    %34 = tpu.matmul %16, %33, %cst_32 {dimension_numbers = #tpu.dot_dimension_numbers<[1], [0], [0], [1], [0, 0, 1, 1], [], []>} : vector<8x64xbf16>, vector<64x256xbf16>, vector<8x256xf32> -> vector<8x256xf32>
    %35 = arith.addf %31, %34 : vector<8x256xf32>
    %36 = vector.broadcast %0 : vector<1x256xf32> to vector<8x256xf32>
    %37 = arith.mulf %35, %36 : vector<8x256xf32>
    %38 = vector.broadcast %1 : vector<1x256xf32> to vector<8x256xf32>
    %39 = arith.addf %37, %38 : vector<8x256xf32>
    %c0_33 = arith.constant 0 : index
    %c0_34 = arith.constant 0 : index
    %c0_35 = arith.constant 0 : index
    %40 = vector.load %arg2[%c0_33, %c0_34, %c0_35] : memref<2x10x64xf32, #tpu.memory_space<vmem>>, vector<1x8x64xf32>
    %41 = vector.shape_cast %40 : vector<1x8x64xf32> to vector<8x64xf32>
    %42 = arith.truncf %41 : vector<8x64xf32> to vector<8x64xbf16>
    %c0_36 = arith.constant 0 : index
    %c1_37 = arith.constant 1 : index
    %c0_38 = arith.constant 0 : index
    %43 = vector.load %arg1[%c0_36, %c1_37, %c0_38] : memref<2x10x64xf32, #tpu.memory_space<vmem>>, vector<1x8x64xf32>
    %44 = vector.shape_cast %43 : vector<1x8x64xf32> to vector<8x64xf32>
    %45 = arith.truncf %44 : vector<8x64xf32> to vector<8x64xbf16>
    %c0_39 = arith.constant 0 : index
    %c1_40 = arith.constant 1 : index
    %c0_41 = arith.constant 0 : index
    %46 = vector.load %arg2[%c0_39, %c1_40, %c0_41] : memref<2x10x64xf32, #tpu.memory_space<vmem>>, vector<1x8x64xf32>
    %47 = vector.shape_cast %46 : vector<1x8x64xf32> to vector<8x64xf32>
    %48 = arith.truncf %47 : vector<8x64xf32> to vector<8x64xbf16>
    %c0_42 = arith.constant 0 : index
    %c2_43 = arith.constant 2 : index
    %c0_44 = arith.constant 0 : index
    %49 = vector.load %arg1[%c0_42, %c2_43, %c0_44] : memref<2x10x64xf32, #tpu.memory_space<vmem>>, vector<1x8x64xf32>
    %50 = vector.shape_cast %49 : vector<1x8x64xf32> to vector<8x64xf32>
    %51 = arith.truncf %50 : vector<8x64xf32> to vector<8x64xbf16>
    %c0_45 = arith.constant 0 : index
    %c2_46 = arith.constant 2 : index
    %c0_47 = arith.constant 0 : index
    %52 = vector.load %arg2[%c0_45, %c2_46, %c0_47] : memref<2x10x64xf32, #tpu.memory_space<vmem>>, vector<1x8x64xf32>
    %53 = vector.shape_cast %52 : vector<1x8x64xf32> to vector<8x64xf32>
    %54 = arith.truncf %53 : vector<8x64xf32> to vector<8x64xbf16>
    %c0_48 = arith.constant 0 : index
    %c0_49 = arith.constant 0 : index
    %c0_50 = arith.constant 0 : index
    %55 = vector.load %arg3[%c0_48, %c0_49, %c0_50] : memref<5x64x256xbf16, #tpu.memory_space<vmem>>, vector<1x64x256xbf16>
    %56 = vector.shape_cast %55 : vector<1x64x256xbf16> to vector<64x256xbf16>
    %cst_51 = arith.constant dense<0.000000e+00> : vector<8x256xf32>
    %57 = tpu.matmul %42, %56, %cst_51 {dimension_numbers = #tpu.dot_dimension_numbers<[1], [0], [0], [1], [0, 0, 1, 1], [], []>} : vector<8x64xbf16>, vector<64x256xbf16>, vector<8x256xf32> -> vector<8x256xf32>
    %c1_52 = arith.constant 1 : index
    %c0_53 = arith.constant 0 : index
    %c0_54 = arith.constant 0 : index
    %58 = vector.load %arg3[%c1_52, %c0_53, %c0_54] : memref<5x64x256xbf16, #tpu.memory_space<vmem>>, vector<1x64x256xbf16>
    %59 = vector.shape_cast %58 : vector<1x64x256xbf16> to vector<64x256xbf16>
    %cst_55 = arith.constant dense<0.000000e+00> : vector<8x256xf32>
    %60 = tpu.matmul %45, %59, %cst_55 {dimension_numbers = #tpu.dot_dimension_numbers<[1], [0], [0], [1], [0, 0, 1, 1], [], []>} : vector<8x64xbf16>, vector<64x256xbf16>, vector<8x256xf32> -> vector<8x256xf32>
    %61 = arith.addf %57, %60 : vector<8x256xf32>
    %c2_56 = arith.constant 2 : index
    %c0_57 = arith.constant 0 : index
    %c0_58 = arith.constant 0 : index
    %62 = vector.load %arg3[%c2_56, %c0_57, %c0_58] : memref<5x64x256xbf16, #tpu.memory_space<vmem>>, vector<1x64x256xbf16>
    %63 = vector.shape_cast %62 : vector<1x64x256xbf16> to vector<64x256xbf16>
    %cst_59 = arith.constant dense<0.000000e+00> : vector<8x256xf32>
    %64 = tpu.matmul %48, %63, %cst_59 {dimension_numbers = #tpu.dot_dimension_numbers<[1], [0], [0], [1], [0, 0, 1, 1], [], []>} : vector<8x64xbf16>, vector<64x256xbf16>, vector<8x256xf32> -> vector<8x256xf32>
    %65 = arith.addf %61, %64 : vector<8x256xf32>
    %c3_60 = arith.constant 3 : index
    %c0_61 = arith.constant 0 : index
    %c0_62 = arith.constant 0 : index
    %66 = vector.load %arg3[%c3_60, %c0_61, %c0_62] : memref<5x64x256xbf16, #tpu.memory_space<vmem>>, vector<1x64x256xbf16>
    %67 = vector.shape_cast %66 : vector<1x64x256xbf16> to vector<64x256xbf16>
    %cst_63 = arith.constant dense<0.000000e+00> : vector<8x256xf32>
    %68 = tpu.matmul %51, %67, %cst_63 {dimension_numbers = #tpu.dot_dimension_numbers<[1], [0], [0], [1], [0, 0, 1, 1], [], []>} : vector<8x64xbf16>, vector<64x256xbf16>, vector<8x256xf32> -> vector<8x256xf32>
    %69 = arith.addf %65, %68 : vector<8x256xf32>
    %c4_64 = arith.constant 4 : index
    %c0_65 = arith.constant 0 : index
    %c0_66 = arith.constant 0 : index
    %70 = vector.load %arg3[%c4_64, %c0_65, %c0_66] : memref<5x64x256xbf16, #tpu.memory_space<vmem>>, vector<1x64x256xbf16>
    %71 = vector.shape_cast %70 : vector<1x64x256xbf16> to vector<64x256xbf16>
    %cst_67 = arith.constant dense<0.000000e+00> : vector<8x256xf32>
    %72 = tpu.matmul %54, %71, %cst_67 {dimension_numbers = #tpu.dot_dimension_numbers<[1], [0], [0], [1], [0, 0, 1, 1], [], []>} : vector<8x64xbf16>, vector<64x256xbf16>, vector<8x256xf32> -> vector<8x256xf32>
    %73 = arith.addf %69, %72 : vector<8x256xf32>
    %74 = vector.broadcast %0 : vector<1x256xf32> to vector<8x256xf32>
    %75 = arith.mulf %73, %74 : vector<8x256xf32>
    %76 = vector.broadcast %1 : vector<1x256xf32> to vector<8x256xf32>
    %77 = arith.addf %75, %76 : vector<8x256xf32>
    %78 = arith.maximumf %39, %77 : vector<8x256xf32>
    %79 = vector.extract_strided_slice %78 {offsets = [0, 0], sizes = [8, 128], strides = [1, 1]} : vector<8x256xf32> to vector<8x128xf32>
    %80 = vector.extract_strided_slice %78 {offsets = [0, 128], sizes = [8, 128], strides = [1, 1]} : vector<8x256xf32> to vector<8x128xf32>
    %81 = arith.maximumf %79, %80 : vector<8x128xf32>
    %cst_68 = arith.constant 0.000000e+00 : f32
    %82 = vector.broadcast %cst_68 : f32 to vector<8x128xf32>
    %83 = arith.maximumf %81, %82 : vector<8x128xf32>
    %c0_69 = arith.constant 0 : index
    %c0_70 = arith.constant 0 : index
    %c0_71 = arith.constant 0 : index
    %84 = vector.load %arg6[%c0_69, %c0_70, %c0_71] : memref<2x8x128xf32, #tpu.memory_space<vmem>>, vector<1x8x128xf32>
    %85 = vector.shape_cast %84 : vector<1x8x128xf32> to vector<8x128xf32>
    %86 = vector.shape_cast %83 : vector<8x128xf32> to vector<1x8x128xf32>
    tpu.vector_store %arg6[%c0_69, %c0_70, %c0_71], %86 {strides = array<i32>} : memref<2x8x128xf32, #tpu.memory_space<vmem>>, vector<1x8x128xf32>,
    %c1_72 = arith.constant 1 : index
    %c0_73 = arith.constant 0 : index
    %c0_74 = arith.constant 0 : index
    %87 = vector.load %arg1[%c1_72, %c0_73, %c0_74] : memref<2x10x64xf32, #tpu.memory_space<vmem>>, vector<1x8x64xf32>
    %88 = vector.shape_cast %87 : vector<1x8x64xf32> to vector<8x64xf32>
    %89 = arith.truncf %88 : vector<8x64xf32> to vector<8x64xbf16>
    %c1_75 = arith.constant 1 : index
    %c0_76 = arith.constant 0 : index
    %c0_77 = arith.constant 0 : index
    %90 = vector.load %arg2[%c1_75, %c0_76, %c0_77] : memref<2x10x64xf32, #tpu.memory_space<vmem>>, vector<1x8x64xf32>
    %91 = vector.shape_cast %90 : vector<1x8x64xf32> to vector<8x64xf32>
    %92 = arith.truncf %91 : vector<8x64xf32> to vector<8x64xbf16>
    %c1_78 = arith.constant 1 : index
    %c1_79 = arith.constant 1 : index
    %c0_80 = arith.constant 0 : index
    %93 = vector.load %arg1[%c1_78, %c1_79, %c0_80] : memref<2x10x64xf32, #tpu.memory_space<vmem>>, vector<1x8x64xf32>
    %94 = vector.shape_cast %93 : vector<1x8x64xf32> to vector<8x64xf32>
    %95 = arith.truncf %94 : vector<8x64xf32> to vector<8x64xbf16>
    %c1_81 = arith.constant 1 : index
    %c1_82 = arith.constant 1 : index
    %c0_83 = arith.constant 0 : index
    %96 = vector.load %arg2[%c1_81, %c1_82, %c0_83] : memref<2x10x64xf32, #tpu.memory_space<vmem>>, vector<1x8x64xf32>
    %97 = vector.shape_cast %96 : vector<1x8x64xf32> to vector<8x64xf32>
    %98 = arith.truncf %97 : vector<8x64xf32> to vector<8x64xbf16>
    %c1_84 = arith.constant 1 : index
    %c2_85 = arith.constant 2 : index
    %c0_86 = arith.constant 0 : index
    %99 = vector.load %arg1[%c1_84, %c2_85, %c0_86] : memref<2x10x64xf32, #tpu.memory_space<vmem>>, vector<1x8x64xf32>
    %100 = vector.shape_cast %99 : vector<1x8x64xf32> to vector<8x64xf32>
    %101 = arith.truncf %100 : vector<8x64xf32> to vector<8x64xbf16>
    %c0_87 = arith.constant 0 : index
    %c0_88 = arith.constant 0 : index
    %c0_89 = arith.constant 0 : index
    %102 = vector.load %arg3[%c0_87, %c0_88, %c0_89] : memref<5x64x256xbf16, #tpu.memory_space<vmem>>, vector<1x64x256xbf16>
    %103 = vector.shape_cast %102 : vector<1x64x256xbf16> to vector<64x256xbf16>
    %cst_90 = arith.constant dense<0.000000e+00> : vector<8x256xf32>
    %104 = tpu.matmul %89, %103, %cst_90 {dimension_numbers = #tpu.dot_dimension_numbers<[1], [0], [0], [1], [0, 0, 1, 1], [], []>} : vector<8x64xbf16>, vector<64x256xbf16>, vector<8x256xf32> -> vector<8x256xf32>
    %c1_91 = arith.constant 1 : index
    %c0_92 = arith.constant 0 : index
    %c0_93 = arith.constant 0 : index
    %105 = vector.load %arg3[%c1_91, %c0_92, %c0_93] : memref<5x64x256xbf16, #tpu.memory_space<vmem>>, vector<1x64x256xbf16>
    %106 = vector.shape_cast %105 : vector<1x64x256xbf16> to vector<64x256xbf16>
    %cst_94 = arith.constant dense<0.000000e+00> : vector<8x256xf32>
    %107 = tpu.matmul %92, %106, %cst_94 {dimension_numbers = #tpu.dot_dimension_numbers<[1], [0], [0], [1], [0, 0, 1, 1], [], []>} : vector<8x64xbf16>, vector<64x256xbf16>, vector<8x256xf32> -> vector<8x256xf32>
    %108 = arith.addf %104, %107 : vector<8x256xf32>
    %c2_95 = arith.constant 2 : index
    %c0_96 = arith.constant 0 : index
    %c0_97 = arith.constant 0 : index
    %109 = vector.load %arg3[%c2_95, %c0_96, %c0_97] : memref<5x64x256xbf16, #tpu.memory_space<vmem>>, vector<1x64x256xbf16>
    %110 = vector.shape_cast %109 : vector<1x64x256xbf16> to vector<64x256xbf16>
    %cst_98 = arith.constant dense<0.000000e+00> : vector<8x256xf32>
    %111 = tpu.matmul %95, %110, %cst_98 {dimension_numbers = #tpu.dot_dimension_numbers<[1], [0], [0], [1], [0, 0, 1, 1], [], []>} : vector<8x64xbf16>, vector<64x256xbf16>, vector<8x256xf32> -> vector<8x256xf32>
    %112 = arith.addf %108, %111 : vector<8x256xf32>
    %c3_99 = arith.constant 3 : index
    %c0_100 = arith.constant 0 : index
    %c0_101 = arith.constant 0 : index
    %113 = vector.load %arg3[%c3_99, %c0_100, %c0_101] : memref<5x64x256xbf16, #tpu.memory_space<vmem>>, vector<1x64x256xbf16>
    %114 = vector.shape_cast %113 : vector<1x64x256xbf16> to vector<64x256xbf16>
    %cst_102 = arith.constant dense<0.000000e+00> : vector<8x256xf32>
    %115 = tpu.matmul %98, %114, %cst_102 {dimension_numbers = #tpu.dot_dimension_numbers<[1], [0], [0], [1], [0, 0, 1, 1], [], []>} : vector<8x64xbf16>, vector<64x256xbf16>, vector<8x256xf32> -> vector<8x256xf32>
    %116 = arith.addf %112, %115 : vector<8x256xf32>
    %c4_103 = arith.constant 4 : index
    %c0_104 = arith.constant 0 : index
    %c0_105 = arith.constant 0 : index
    %117 = vector.load %arg3[%c4_103, %c0_104, %c0_105] : memref<5x64x256xbf16, #tpu.memory_space<vmem>>, vector<1x64x256xbf16>
    %118 = vector.shape_cast %117 : vector<1x64x256xbf16> to vector<64x256xbf16>
    %cst_106 = arith.constant dense<0.000000e+00> : vector<8x256xf32>
    %119 = tpu.matmul %101, %118, %cst_106 {dimension_numbers = #tpu.dot_dimension_numbers<[1], [0], [0], [1], [0, 0, 1, 1], [], []>} : vector<8x64xbf16>, vector<64x256xbf16>, vector<8x256xf32> -> vector<8x256xf32>
    %120 = arith.addf %116, %119 : vector<8x256xf32>
    %121 = vector.broadcast %0 : vector<1x256xf32> to vector<8x256xf32>
    %122 = arith.mulf %120, %121 : vector<8x256xf32>
    %123 = vector.broadcast %1 : vector<1x256xf32> to vector<8x256xf32>
    %124 = arith.addf %122, %123 : vector<8x256xf32>
    %c1_107 = arith.constant 1 : index
    %c0_108 = arith.constant 0 : index
    %c0_109 = arith.constant 0 : index
    %125 = vector.load %arg2[%c1_107, %c0_108, %c0_109] : memref<2x10x64xf32, #tpu.memory_space<vmem>>, vector<1x8x64xf32>
    %126 = vector.shape_cast %125 : vector<1x8x64xf32> to vector<8x64xf32>
    %127 = arith.truncf %126 : vector<8x64xf32> to vector<8x64xbf16>
    %c1_110 = arith.constant 1 : index
    %c1_111 = arith.constant 1 : index
    %c0_112 = arith.constant 0 : index
    %128 = vector.load %arg1[%c1_110, %c1_111, %c0_112] : memref<2x10x64xf32, #tpu.memory_space<vmem>>, vector<1x8x64xf32>
    %129 = vector.shape_cast %128 : vector<1x8x64xf32> to vector<8x64xf32>
    %130 = arith.truncf %129 : vector<8x64xf32> to vector<8x64xbf16>
    %c1_113 = arith.constant 1 : index
    %c1_114 = arith.constant 1 : index
    %c0_115 = arith.constant 0 : index
    %131 = vector.load %arg2[%c1_113, %c1_114, %c0_115] : memref<2x10x64xf32, #tpu.memory_space<vmem>>, vector<1x8x64xf32>
    %132 = vector.shape_cast %131 : vector<1x8x64xf32> to vector<8x64xf32>
    %133 = arith.truncf %132 : vector<8x64xf32> to vector<8x64xbf16>
    %c1_116 = arith.constant 1 : index
    %c2_117 = arith.constant 2 : index
    %c0_118 = arith.constant 0 : index
    %134 = vector.load %arg1[%c1_116, %c2_117, %c0_118] : memref<2x10x64xf32, #tpu.memory_space<vmem>>, vector<1x8x64xf32>
    %135 = vector.shape_cast %134 : vector<1x8x64xf32> to vector<8x64xf32>
    %136 = arith.truncf %135 : vector<8x64xf32> to vector<8x64xbf16>
    %c1_119 = arith.constant 1 : index
    %c2_120 = arith.constant 2 : index
    %c0_121 = arith.constant 0 : index
    %137 = vector.load %arg2[%c1_119, %c2_120, %c0_121] : memref<2x10x64xf32, #tpu.memory_space<vmem>>, vector<1x8x64xf32>
    %138 = vector.shape_cast %137 : vector<1x8x64xf32> to vector<8x64xf32>
    %139 = arith.truncf %138 : vector<8x64xf32> to vector<8x64xbf16>
    %c0_122 = arith.constant 0 : index
    %c0_123 = arith.constant 0 : index
    %c0_124 = arith.constant 0 : index
    %140 = vector.load %arg3[%c0_122, %c0_123, %c0_124] : memref<5x64x256xbf16, #tpu.memory_space<vmem>>, vector<1x64x256xbf16>
    %141 = vector.shape_cast %140 : vector<1x64x256xbf16> to vector<64x256xbf16>
    %cst_125 = arith.constant dense<0.000000e+00> : vector<8x256xf32>
    %142 = tpu.matmul %127, %141, %cst_125 {dimension_numbers = #tpu.dot_dimension_numbers<[1], [0], [0], [1], [0, 0, 1, 1], [], []>} : vector<8x64xbf16>, vector<64x256xbf16>, vector<8x256xf32> -> vector<8x256xf32>
    %c1_126 = arith.constant 1 : index
    %c0_127 = arith.constant 0 : index
    %c0_128 = arith.constant 0 : index
    %143 = vector.load %arg3[%c1_126, %c0_127, %c0_128] : memref<5x64x256xbf16, #tpu.memory_space<vmem>>, vector<1x64x256xbf16>
    %144 = vector.shape_cast %143 : vector<1x64x256xbf16> to vector<64x256xbf16>
    %cst_129 = arith.constant dense<0.000000e+00> : vector<8x256xf32>
    %145 = tpu.matmul %130, %144, %cst_129 {dimension_numbers = #tpu.dot_dimension_numbers<[1], [0], [0], [1], [0, 0, 1, 1], [], []>} : vector<8x64xbf16>, vector<64x256xbf16>, vector<8x256xf32> -> vector<8x256xf32>
    %146 = arith.addf %142, %145 : vector<8x256xf32>
    %c2_130 = arith.constant 2 : index
    %c0_131 = arith.constant 0 : index
    %c0_132 = arith.constant 0 : index
    %147 = vector.load %arg3[%c2_130, %c0_131, %c0_132] : memref<5x64x256xbf16, #tpu.memory_space<vmem>>, vector<1x64x256xbf16>
    %148 = vector.shape_cast %147 : vector<1x64x256xbf16> to vector<64x256xbf16>
    %cst_133 = arith.constant dense<0.000000e+00> : vector<8x256xf32>
    %149 = tpu.matmul %133, %148, %cst_133 {dimension_numbers = #tpu.dot_dimension_numbers<[1], [0], [0], [1], [0, 0, 1, 1], [], []>} : vector<8x64xbf16>, vector<64x256xbf16>, vector<8x256xf32> -> vector<8x256xf32>
    %150 = arith.addf %146, %149 : vector<8x256xf32>
    %c3_134 = arith.constant 3 : index
    %c0_135 = arith.constant 0 : index
    %c0_136 = arith.constant 0 : index
    %151 = vector.load %arg3[%c3_134, %c0_135, %c0_136] : memref<5x64x256xbf16, #tpu.memory_space<vmem>>, vector<1x64x256xbf16>
    %152 = vector.shape_cast %151 : vector<1x64x256xbf16> to vector<64x256xbf16>
    %cst_137 = arith.constant dense<0.000000e+00> : vector<8x256xf32>
    %153 = tpu.matmul %136, %152, %cst_137 {dimension_numbers = #tpu.dot_dimension_numbers<[1], [0], [0], [1], [0, 0, 1, 1], [], []>} : vector<8x64xbf16>, vector<64x256xbf16>, vector<8x256xf32> -> vector<8x256xf32>
    %154 = arith.addf %150, %153 : vector<8x256xf32>
    %c4_138 = arith.constant 4 : index
    %c0_139 = arith.constant 0 : index
    %c0_140 = arith.constant 0 : index
    %155 = vector.load %arg3[%c4_138, %c0_139, %c0_140] : memref<5x64x256xbf16, #tpu.memory_space<vmem>>, vector<1x64x256xbf16>
    %156 = vector.shape_cast %155 : vector<1x64x256xbf16> to vector<64x256xbf16>
    %cst_141 = arith.constant dense<0.000000e+00> : vector<8x256xf32>
    %157 = tpu.matmul %139, %156, %cst_141 {dimension_numbers = #tpu.dot_dimension_numbers<[1], [0], [0], [1], [0, 0, 1, 1], [], []>} : vector<8x64xbf16>, vector<64x256xbf16>, vector<8x256xf32> -> vector<8x256xf32>
    %158 = arith.addf %154, %157 : vector<8x256xf32>
    %159 = vector.broadcast %0 : vector<1x256xf32> to vector<8x256xf32>
    %160 = arith.mulf %158, %159 : vector<8x256xf32>
    %161 = vector.broadcast %1 : vector<1x256xf32> to vector<8x256xf32>
    %162 = arith.addf %160, %161 : vector<8x256xf32>
    %163 = arith.maximumf %124, %162 : vector<8x256xf32>
    %164 = vector.extract_strided_slice %163 {offsets = [0, 0], sizes = [8, 128], strides = [1, 1]} : vector<8x256xf32> to vector<8x128xf32>
    %165 = vector.extract_strided_slice %163 {offsets = [0, 128], sizes = [8, 128], strides = [1, 1]} : vector<8x256xf32> to vector<8x128xf32>
    %166 = arith.maximumf %164, %165 : vector<8x128xf32>
    %cst_142 = arith.constant 0.000000e+00 : f32
    %167 = vector.broadcast %cst_142 : f32 to vector<8x128xf32>
    %168 = arith.maximumf %166, %167 : vector<8x128xf32>
    %c1_143 = arith.constant 1 : index
    %c0_144 = arith.constant 0 : index
    %c0_145 = arith.constant 0 : index
    %169 = vector.load %arg6[%c1_143, %c0_144, %c0_145] : memref<2x8x128xf32, #tpu.memory_space<vmem>>, vector<1x8x128xf32>
    %170 = vector.shape_cast %169 : vector<1x8x128xf32> to vector<8x128xf32>
    %171 = vector.shape_cast %168 : vector<8x128xf32> to vector<1x8x128xf32>
    tpu.vector_store %arg6[%c1_143, %c0_144, %c0_145], %171 {strides = array<i32>} : memref<2x8x128xf32, #tpu.memory_space<vmem>>, vector<1x8x128xf32>,
    return
  }
  func.func @transform_0(%arg0: i32) -> (i32, i32, i32) {
    %c0_i32 = arith.constant 0 : i32
    %c0_i32_0 = arith.constant 0 : i32
    %c0_i32_1 = arith.constant 0 : i32
    return %arg0, %c0_i32, %c0_i32_0 : i32, i32, i32
  }
  func.func @transform_1(%arg0: i32) -> (i32, i32, i32) {
    %c0_i32 = arith.constant 0 : i32
    %c0_i32_0 = arith.constant 0 : i32
    %c0_i32_1 = arith.constant 0 : i32
    return %arg0, %c0_i32, %c0_i32_0 : i32, i32, i32
  }
  func.func @transform_2(%arg0: i32) -> (i32, i32, i32) {
    %c0_i32 = arith.constant 0 : i32
    %c0_i32_0 = arith.constant 0 : i32
    %c0_i32_1 = arith.constant 0 : i32
    %c0_i32_2 = arith.constant 0 : i32
    return %c0_i32, %c0_i32_0, %c0_i32_1 : i32, i32, i32
  }
  func.func @transform_3(%arg0: i32) -> (i32, i32) {
    %c0_i32 = arith.constant 0 : i32
    %c0_i32_0 = arith.constant 0 : i32
    %c0_i32_1 = arith.constant 0 : i32
    return %c0_i32, %c0_i32_0 : i32, i32
  }
  func.func @transform_4(%arg0: i32) -> (i32, i32) {
    %c0_i32 = arith.constant 0 : i32
    %c0_i32_0 = arith.constant 0 : i32
    %c0_i32_1 = arith.constant 0 : i32
    return %c0_i32, %c0_i32_0 : i32, i32
  }
  func.func @transform_5(%arg0: i32) -> (i32, i32, i32) {
    %c0_i32 = arith.constant 0 : i32
    %c0_i32_0 = arith.constant 0 : i32
    %c0_i32_1 = arith.constant 0 : i32
    return %arg0, %c0_i32, %c0_i32_0 : i32, i32, i32
  }
}

</mosaic_0001>

<bundles_post_ra>
// kernel: tile.18
= control target key start
LH: loop header
LB: loop body
LE: loop exit
PB: predicated region body
PF: predicated region fallthrough
CT: control target
= control target key end

     0   :  { %s28_s0 = inlined_call_operand.vmem [shape: f32[16], index: 0, kind: input, shape index: {}]   ;;  %s29_s1 = inlined_call_operand.vmem [shape: f32[16,16], index: 1, kind: output, shape index: {}]  }
   0x1   :  { %v4_v0 = vld [vmem:[%s28_s0] ss:$0 sm:$0xff] }
   0x2   :  { %5 = vst [vmem:[%s29_s1] sm:$0xff] %v4_v0  ;;  %8 = vst [vmem:[%s29_s1 + $0x8] sm:$0xff] %v4_v0 }

// kernel: tile.19
= control target key start
LH: loop header
LB: loop body
LE: loop exit
PB: predicated region body
PF: predicated region fallthrough
CT: control target
= control target key end

     0   :  { %s7_s6 = smov 3  ;;  %s21_s9 = smov 3  ;;  %vm4_vm0 = vcmask 130048   ;;  %vm11_vm1 = vcmask 1048448   ;;  %vm18_vm2 = vcmask 917248   ;;  %vm25_vm3 = vcmask 786048   ;;  %s131_s0 = inlined_call_operand.vmem [shape: f32[16,16], index: 0, kind: input, shape index: {}]   ;;  %s132_s1 = inlined_call_operand.vmem [shape: f32[1,256], index: 1, kind: output, shape index: {}]  }
   0x1   :  { %v69_v0 = vld [vmem:[%s131_s0 + $0x7] ss:$8 sm:%s7_s6]   ;;  %s84_s10 = smov 112   ;;  %v71_v1 = vld [vmem:[%s131_s0 + $0x5] ss:$8 sm:%s21_s9]   ;;  %s14_s13 = smov 3 }
   0x2   :  { %9 = vrot.lane.b32.xlu0 %v69_v0, %s84_s10  ;;  %s85_s14 = smov 80   ;;  %v70_v2 = vld [vmem:[%s131_s0 + $0x6] ss:$8 sm:%s14_s13]   ;;  %s28_s17 = smov 3  ;;  %vm32_vm4 = vcmask 654848   ;;  %vm39_vm5 = vcmask 523648  }
   0x3   :  { %23 = vrot.lane.b32.xlu1 %v71_v1, %s85_s14  ;;  %v72_v3 = vld [vmem:[%s131_s0 + $0x4] ss:$8 sm:%s28_s17]   ;;  %s35_s20 = smov 3  ;;  %s42_s21 = smov 3  ;;  %vm46_vm6 = vcmask 392448   ;;  %vm53_vm7 = vcmask 261248  }
   0x4   :  { %s86_s22 = smov 96   ;;  %s87_s23 = smov 64   ;;  %v73_v4 = vld [vmem:[%s131_s0 + $0x3] ss:$8 sm:%s35_s20]   ;;  %v74_v5 = vld [vmem:[%s131_s0 + $0x2] ss:$8 sm:%s42_s21]  }
   0x5   :  { %s2_s26 = smov 3  ;;  %s49_s29 = smov 3 }
   0x6   :  { %16 = vrot.lane.b32.xlu0 %v70_v2, %s86_s22  ;;  %v3_v6 = vld [vmem:[%s131_s0] ss:$8 sm:%s2_s26]   ;;  %s88_s3 = smov 48   ;;  %s89_s4 = smov 32  }
   0x7   :  { %30 = vrot.lane.b32.xlu1 %v72_v3, %s87_s23  ;;  %5 = vst.msk [vmem:[#allocation0] ss:$8 sm:$0x3] %vm4_vm0, %v3_v6   ;;  %v75_v7 = vld [vmem:[%s131_s0 + $0x1] ss:$8 sm:%s49_s29]   ;;  %s90_s0 = smov 16  }
   0xa   :  { %37 = vrot.lane.b32.xlu0 %v73_v4, %s88_s3 }
   0xb   :  { %44 = vrot.lane.b32.xlu1 %v74_v5, %s89_s4 }
   0xe   :  { %51 = vrot.lane.b32.xlu0 %v75_v7, %s90_s0 }
  0x74   :  { %v10_v8 = vpop.permute.xlu0 %9  }
  0x75   :  { %12 = vst.msk [vmem:[#allocation0] ss:$8 sm:$0x3] %vm11_vm1, %v10_v8   ;;  %v24_v9 = vpop.permute.xlu1 %23  }
  0x78   :  { %v17_v10 = vpop.permute.xlu0 %16  }
  0x79   :  { %19 = vst.msk [vmem:[#allocation0] ss:$8 sm:$0x3] %vm18_vm2, %v17_v10   ;;  %v31_v11 = vpop.permute.xlu1 %30  }
  0x7a   :  { %26 = vst.msk [vmem:[#allocation0] ss:$8 sm:$0x3] %vm25_vm3, %v24_v9  }
  0x7b   :  { %33 = vst.msk [vmem:[#allocation0] ss:$8 sm:$0x3] %vm32_vm4, %v31_v11  }
  0x7c   :  { %v38_v12 = vpop.permute.xlu0 %37  }
  0x7d   :  { %40 = vst.msk [vmem:[#allocation0] ss:$8 sm:$0x3] %vm39_vm5, %v38_v12   ;;  %v45_v13 = vpop.permute.xlu1 %44  }
  0x7e   :  { %47 = vst.msk [vmem:[#allocation0] ss:$8 sm:$0x3] %vm46_vm6, %v45_v13  }
  0x80   :  { %v52_v14 = vpop.permute.xlu0 %51  }
  0x81   :  { %54 = vst.msk [vmem:[#allocation0] ss:$8 sm:$0x3] %vm53_vm7, %v52_v14  }
  0x88   :  { %v59_v15 = vld [vmem:[#allocation0] sm:$0x1]  ;;  %v64_v16 = vld [vmem:[#allocation0 + $0x8] sm:$0x1] }
  0x89   :  { %62 = vst [vmem:[%s132_s1] sm:$0x1] %v59_v15  ;;  %76 = vst [vmem:[%s132_s1 + $0x1] sm:$0x1] %v64_v16 }

// kernel: basic_ext_forward.2
= control target key start
LH: loop header
LB: loop body
LE: loop exit
PB: predicated region body
PF: predicated region fallthrough
CT: control target
= control target key end

     0   :  { %s2986_s15 = smov 0   ;;  %s3495_s0 = inlined_call_operand.vmem [shape: f32[16,10,64], index: 0, kind: input, shape index: {}]   ;;  %s3496_s1 = inlined_call_operand.vmem [shape: f32[16,10,64], index: 1, kind: input, shape index: {}]   ;;  %s3497_s2 = inlined_call_operand.vmem [shape: bf16[5,64,256], index: 2, kind: input, shape index: {}]   ;;  %s3498_s3 = inlined_call_operand.vmem [shape: f32[8,4,256], index: 3, kind: output, shape index: {0}]   ;;  %s3499_s4 = inlined_call_operand.vmem [shape: f32[8,4,256], index: 4, kind: output, shape index: {1}]  }
   0x1 LB: > { %s2992_s16 = sadd.s32 4294967295, %s2957_s15   ;;  %p2540_p0 = scmp.ge.s32.totalorder %s2957_s15, 1  ;;  %s2957_s15 = sphi %s2986_s15, %s15_s15  }
   0x2   : > { %p179_p1 = scmp.lt.s32.totalorder %s2957_s15, 9 }
   0x4   : > { %p180_p2 = pnand %p2540_p0, %p179_p1 }
   0x5   : > { %s2541_s19 = sshll.u32 (!%p180_p2), %s2992_s16, 1  ;;  %p231_p4 = scmp.lt.s32.totalorder (!%p180_p2), %s2992_s16, 7 }
   0x6   : > { %183 = sbr.rel (%p180_p2) target bundleno = 409 (0x199), region = 32  ;;  %p218_p3 = scmp.lt.s32.totalorder (!%p180_p2), %s2541_s19, 15 }
   0xb   : > { %v2999_v0 = vld [vmem:[%s3497_s2 + $0x74] ss:$8 sps:$4 sm:$0xff]   ;;  %v2959_v2 = vmov 0   ;;  %v3013_v3 = vld [vmem:[%s3497_s2 + $0x70] ss:$8 sps:$4 sm:$0xff]   ;;  %s3503_s19 = smov (!%p218_p3, %s2541_s19), 15 }
   0xc   : > { %v3005_v1 = vld [vmem:[%s3497_s2 + $0x34] ss:$8 sps:$4 sm:$0xff]   ;;  %345 = vmatprep.mubr.bf16.mxu0 %v2959_v2  ;;  %429 = vmatprep.mubr.bf16.mxu1 %v2959_v2  ;;  %v3018_v4 = vld [vmem:[%s3497_s2 + $0x30] ss:$8 sps:$4 sm:$0xff]   ;;  %v3024_v5 = vld [vmem:[%s3497_s2 + $0x64] ss:$8 sps:$4 sm:$0xff]  }
   0xd   : > { %321 = vmatprep.subr.bf16.mxu0 %v2999_v0  ;;  %405 = vmatprep.subr.bf16.mxu1 %v3005_v1  ;;  %v3031_v6 = vld [vmem:[%s3497_s2 + $0x24] ss:$8 sps:$4 sm:$0xff]   ;;  %v3036_v7 = vld [vmem:[%s3497_s2 + $0x60] ss:$8 sps:$4 sm:$0xff]   ;;  %v3048_v9 = vld [vmem:[%s3497_s2 + $0x54] ss:$8 sps:$4 sm:$0xff]  }
   0xe   : > { %322 = vmatpush1.bf16.msra.mxu0 %v3013_v3  ;;  %406 = vmatpush1.bf16.msra.mxu1 %v3018_v4  ;;  %v3042_v8 = vld [vmem:[%s3497_s2 + $0x20] ss:$8 sps:$4 sm:$0xff]   ;;  %s2877_s10 = sshll.u32 %s3503_s19, 4  ;;  %v3053_v10 = vld [vmem:[%s3497_s2 + $0x14] ss:$8 sps:$4 sm:$0xff]   ;;  %vm309_vm0 = vcmask 523264  }
   0xf   : > { %323 = vmatprep.subr.bf16.mxu0 %v3024_v5  ;;  %407 = vmatprep.subr.bf16.mxu1 %v3031_v6  ;;  %v3058_v11 = vld [vmem:[%s3497_s2 + $0x50] ss:$8 sps:$4 sm:$0xff]   ;;  %v3070_v13 = vld [vmem:[%s3497_s2 + $0x44] ss:$8 sps:$4 sm:$0xff]   ;;  %s3082_s25 = scalar_lea.vmem %s3496_s1, %s2877_s10  ;;  %s3087_s28 = scalar_lea.vmem %s3495_s0, %s2877_s10  ;;  %v3092_v15 = vld [vmem:[%s3497_s2 + $0x40] ss:$8 sps:$4 sm:$0xff]  }
  0x10   : > { %v3063_v12 = vld [vmem:[%s3497_s2 + $0x10] ss:$8 sps:$4 sm:$0xff]   ;;  %v3077_v14 = vld [vmem:[%s3497_s2 + $0x4] ss:$8 sps:$4 sm:$0xff]   ;;  %v3097_v16 = vld [vmem:[%s3497_s2] ss:$8 sps:$4 sm:$0xff]  }
  0x11   : > { %v244_v17 = vld [vmem:[%s3082_s25] sm:$0xff]  ;;  %v3108_v19 = vld [vmem:[%s3497_s2 + $0xb4] ss:$8 sps:$4 sm:$0xff]   ;;  %v3122_v23 = vld [vmem:[%s3497_s2 + $0xb0] ss:$8 sps:$4 sm:$0xff]   ;;  %s3505_s16 = smov (!%p231_p4, %s2992_s16), 7 }
  0x12   : > { %324 = vmatpush1.bf16.msra.mxu0 %v3036_v7  ;;  %408 = vmatpush1.bf16.msra.mxu1 %v3042_v8  ;;  %v242_v18 = vld [vmem:[%s3087_s28] sm:$0xff]  ;;  %v3113_v20 = vld [vmem:[%s3497_s2 + $0xf4] ss:$8 sps:$4 sm:$0xff]   ;;  %v3115_v21 = vpack.c.bf16 %v244_v17, %v244_v17  ;;  %v3127_v24 = vld [vmem:[%s3497_s2 + $0xf0] ss:$8 sps:$4 sm:$0xff]  }
  0x13   : > { %325 = vmatprep.subr.bf16.mxu0 %v3048_v9  ;;  %409 = vmatprep.subr.bf16.mxu1 %v3053_v10  ;;  %v243_v22 = vpack.c.bf16 %v242_v18, %v242_v18  ;;  %v3134_v25 = vld [vmem:[%s3497_s2 + $0xa4] ss:$8 sps:$4 sm:$0xff]   ;;  %v3149_v27 = vld [vmem:[%s3497_s2 + $0xa0] ss:$8 sps:$4 sm:$0xff]   ;;  %v3161_v29 = vld [vmem:[%s3497_s2 + $0x94] ss:$8 sps:$4 sm:$0xff]  }
  0x14   : > { %v3139_v26 = vld [vmem:[%s3497_s2 + $0xe4] ss:$8 sps:$4 sm:$0xff]   ;;  %v3154_v28 = vld [vmem:[%s3497_s2 + $0xe0] ss:$8 sps:$4 sm:$0xff]   ;;  %v3166_v30 = vld [vmem:[%s3497_s2 + $0xd4] ss:$8 sps:$4 sm:$0xff]  }
  0x15   : > { %v3173_v31 = vld [vmem:[%s3497_s2 + $0x90] ss:$8 sps:$4 sm:$0xff]   ;;  %v3185_v33 = vld [vmem:[%s3497_s2 + $0x84] ss:$8 sps:$4 sm:$0xff]   ;;  %v3197_v35 = vld [vmem:[%s3497_s2 + $0x80] ss:$8 sps:$4 sm:$0xff]  }
  0x16   : > { %326 = vmatpush1.bf16.msra.mxu0 %v3058_v11  ;;  %410 = vmatpush1.bf16.msra.mxu1 %v3063_v12  ;;  %v3178_v32 = vld [vmem:[%s3497_s2 + $0xd0] ss:$8 sps:$4 sm:$0xff]   ;;  %v3192_v34 = vld [vmem:[%s3497_s2 + $0xc4] ss:$8 sps:$4 sm:$0xff]   ;;  %v3204_v36 = vld [vmem:[%s3497_s2 + $0xc0] ss:$8 sps:$4 sm:$0xff]  }
  0x17   : > { %327 = vmatprep.subr.bf16.mxu0 %v3070_v13  ;;  %411 = vmatprep.subr.bf16.mxu1 %v3077_v14  ;;  %v246_v37 = vld [vmem:[%s3087_s28 + $0x1] sm:$0xff]  ;;  %v3213_v39 = vld [vmem:[%s3497_s2 + $0x134] ss:$8 sps:$4 sm:$0xff]   ;;  %v3220_v42 = vld [vmem:[%s3497_s2 + $0x130] ss:$8 sps:$4 sm:$0xff]  }
  0x18   : > { %v248_v38 = vld [vmem:[%s3082_s25 + $0x1] sm:$0xff]  ;;  %v247_v40 = vpack.c.bf16 %v246_v37, %v246_v37  ;;  %v3243_v45 = vld [vmem:[%s3497_s2 + $0x114] ss:$8 sps:$4 sm:$0xff]   ;;  %v3252_v46 = vld [vmem:[%s3497_s2 + $0x110] ss:$8 sps:$4 sm:$0xff]  }
  0x19   : > { %v249_v41 = vpack.c.bf16 %v248_v38, %v248_v38  ;;  %v3227_v43 = vld [vmem:[%s3497_s2 + $0x124] ss:$8 sps:$4 sm:$0xff]   ;;  %v3236_v44 = vld [vmem:[%s3497_s2 + $0x120] ss:$8 sps:$4 sm:$0xff]   ;;  %v2708_v53 = vld [vmem:[%s3082_s25 + $0x10] sm:$0xff] }
  0x1a   : > { %328 = vmatpush1.bf16.msra.mxu0 %v3092_v15  ;;  %412 = vmatpush1.bf16.msra.mxu1 %v3097_v16  ;;  %v3259_v47 = vld [vmem:[%s3497_s2 + $0x104] ss:$8 sps:$4 sm:$0xff]   ;;  %v3266_v48 = vld [vmem:[%s3497_s2 + $0x100] ss:$8 sps:$4 sm:$0xff]   ;;  %v2707_v54 = vld [vmem:[%s3087_s28 + $0x10] sm:$0xff]  ;;  %v3335_v55 = vpack.c.bf16 %v2708_v53, %v2708_v53 }
  0x1b   : > { %498 = vmatprep.subr.bf16.mxu0 %v3108_v19  ;;  %593 = vmatprep.subr.bf16.mxu1 %v3113_v20  ;;  %v250_v49 = vld [vmem:[%s3087_s28 + $0x2] sm:$0xff]  ;;  %v1344_v56 = vpack.c.bf16 %v2707_v54, %v2707_v54  ;;  %v2709_v57 = vld [vmem:[%s3087_s28 + $0x11] sm:$0xff]  ;;  %v2960_v38 = vmov 1966171168  }
  0x1c   : > { %v251_v50 = vpack.c.bf16 %v250_v49, %v250_v49  ;;  %v804_v51 = vld [vmem:[%s3082_s25 + $0x2] sm:$0xff]  ;;  %v2710_v58 = vld [vmem:[%s3082_s25 + $0x11] sm:$0xff]  ;;  %v1349_v59 = vpack.c.bf16 %v2709_v57, %v2709_v57 }
  0x1d   : > { %2567 = vmatmul.mubr.msk.bf16.vlgmr.msra.gmra.mxu0 %vm309_vm0, %v3115_v21  ;;  %2576 = vmatmul.mubr.msk.bf16.vlgmr.msra.gmra.mxu1 %vm309_vm0, %v243_v22  ;;  %v805_v52 = vpack.c.bf16 %v804_v51, %v804_v51  ;;  %v1351_v60 = vpack.c.bf16 %v2710_v58, %v2710_v58  ;;  %v2711_v61 = vld [vmem:[%s3087_s28 + $0x12] sm:$0xff] }
  0x1e   : > { %499 = vmatpush1.bf16.msra.mxu0 %v3122_v23  ;;  %594 = vmatpush1.bf16.msra.mxu1 %v3127_v24  ;;  %v1353_v62 = vpack.c.bf16 %v2711_v61, %v2711_v61  ;;  %v2795_v63 = vld [vmem:[%s3082_s25 + $0x12] sm:$0xff]  ;;  %s2879_s25 = sshll.u32 %s3505_s16, 3 }
  0x1f   : > { %500 = vmatprep.subr.bf16.mxu0 %v3134_v25  ;;  %595 = vmatprep.subr.bf16.mxu1 %v3139_v26  ;;  %s3440_s12 = scalar_lea.vmem %s3498_s3, %s2879_s25  ;;  %s3456_s17 = scalar_lea.vmem %s3499_s4, %s2879_s25 }
  0x20   : > { %522 = vmatprep.mubr.bf16.mxu0 %v2959_v2  ;;  %617 = vmatprep.mubr.bf16.mxu1 %v2959_v2 }
  0x22   : > { %501 = vmatpush1.bf16.msra.mxu0 %v3149_v27  ;;  %596 = vmatpush1.bf16.msra.mxu1 %v3154_v28 }
  0x23   : > { %502 = vmatprep.subr.bf16.mxu0 %v3161_v29  ;;  %597 = vmatprep.subr.bf16.mxu1 %v3166_v30 }
  0x26   : > { %503 = vmatpush1.bf16.msra.mxu0 %v3173_v31  ;;  %598 = vmatpush1.bf16.msra.mxu1 %v3178_v32 }
  0x27   : > { %504 = vmatprep.subr.bf16.mxu0 %v3185_v33  ;;  %599 = vmatprep.subr.bf16.mxu1 %v3192_v34 }
  0x2a   : > { %505 = vmatpush1.bf16.msra.mxu0 %v3197_v35  ;;  %600 = vmatpush1.bf16.msra.mxu1 %v3204_v36 }
  0x2b   : > { %688 = vmatprep.subr.bf16.mxu0 %v3213_v39  ;;  %873 = vmatprep.subr.bf16.mxu1 %v2999_v0 }
  0x2d   : > { %2593 = vmatmul.mubr.msk.bf16.vlgmr.msra.gmra.mxu0 %vm309_vm0, %v247_v40  ;;  %2610 = vmatmul.mubr.msk.bf16.vlgmr.msra.gmra.mxu1 %vm309_vm0, %v249_v41 }
  0x2e   : > { %689 = vmatpush1.bf16.msra.mxu0 %v3220_v42  ;;  %874 = vmatpush1.bf16.msra.mxu1 %v3013_v3 }
  0x2f   : > { %690 = vmatprep.subr.bf16.mxu0 %v3227_v43  ;;  %875 = vmatprep.subr.bf16.mxu1 %v3024_v5 }
  0x30   : > { %712 = vmatprep.mubr.bf16.mxu0 %v2959_v2  ;;  %897 = vmatprep.mubr.bf16.mxu1 %v2959_v2 }
  0x32   : > { %691 = vmatpush1.bf16.msra.mxu0 %v3236_v44  ;;  %876 = vmatpush1.bf16.msra.mxu1 %v3036_v7 }
  0x33   : > { %692 = vmatprep.subr.bf16.mxu0 %v3243_v45  ;;  %877 = vmatprep.subr.bf16.mxu1 %v3048_v9 }
  0x36   : > { %693 = vmatpush1.bf16.msra.mxu0 %v3252_v46  ;;  %878 = vmatpush1.bf16.msra.mxu1 %v3058_v11 }
  0x37   : > { %694 = vmatprep.subr.bf16.mxu0 %v3259_v47  ;;  %879 = vmatprep.subr.bf16.mxu1 %v3070_v13 }
  0x3a   : > { %695 = vmatpush1.bf16.msra.mxu0 %v3266_v48  ;;  %880 = vmatpush1.bf16.msra.mxu1 %v3092_v15 }
  0x3b   : > { %957 = vmatprep.subr.bf16.mxu0 %v3005_v1  ;;  %1049 = vmatprep.subr.bf16.mxu1 %v3108_v19 }
  0x3d   : > { %2627 = vmatmul.mubr.msk.bf16.vlgmr.msra.gmra.mxu0 %vm309_vm0, %v251_v50  ;;  %2644 = vmatmul.mubr.msk.bf16.vlgmr.msra.gmra.mxu1 %vm309_vm0, %v247_v40  ;;  %v746_v40 = vlaneseq }
  0x3e   : > { %958 = vmatpush1.bf16.msra.mxu0 %v3018_v4  ;;  %1050 = vmatpush1.bf16.msra.mxu1 %v3122_v23 }
  0x3f   : > { %959 = vmatprep.subr.bf16.mxu0 %v3031_v6  ;;  %1051 = vmatprep.subr.bf16.mxu1 %v3134_v25  ;;  %vm3442_vm1 = vcmp.lt.s32.totalorder %v746_v40, 256 }
  0x40   : > { %981 = vmatprep.mubr.bf16.mxu0 %v2959_v2  ;;  %1073 = vmatprep.mubr.bf16.mxu1 %v2959_v2 }
  0x42   : > { %960 = vmatpush1.bf16.msra.mxu0 %v3042_v8  ;;  %1052 = vmatpush1.bf16.msra.mxu1 %v3149_v27 }
  0x43   : > { %961 = vmatprep.subr.bf16.mxu0 %v3053_v10  ;;  %1053 = vmatprep.subr.bf16.mxu1 %v3161_v29 }
  0x46   : > { %962 = vmatpush1.bf16.msra.mxu0 %v3063_v12  ;;  %1054 = vmatpush1.bf16.msra.mxu1 %v3173_v31 }
  0x47   : > { %963 = vmatprep.subr.bf16.mxu0 %v3077_v14  ;;  %1055 = vmatprep.subr.bf16.mxu1 %v3185_v33 }
  0x4a   : > { %964 = vmatpush1.bf16.msra.mxu0 %v3097_v16  ;;  %1056 = vmatpush1.bf16.msra.mxu1 %v3197_v35 }
  0x4b   : > { %1143 = vmatprep.subr.bf16.mxu0 %v3113_v20  ;;  %1237 = vmatprep.subr.bf16.mxu1 %v3213_v39 }
  0x4d   : > { %2653 = vmatmul.mubr.msk.bf16.vlgmr.msra.gmra.mxu0 %vm309_vm0, %v3115_v21  ;;  %2670 = vmatmul.mubr.msk.bf16.vlgmr.msra.gmra.mxu1 %vm309_vm0, %v249_v41 }
  0x4e   : > { %1144 = vmatpush1.bf16.msra.mxu0 %v3127_v24  ;;  %1238 = vmatpush1.bf16.msra.mxu1 %v3220_v42 }
  0x4f   : > { %1145 = vmatprep.subr.bf16.mxu0 %v3139_v26  ;;  %1239 = vmatprep.subr.bf16.mxu1 %v3227_v43 }
  0x50   : > { %1167 = vmatprep.mubr.bf16.mxu0 %v2959_v2  ;;  %1261 = vmatprep.mubr.bf16.mxu1 %v2959_v2 }
  0x52   : > { %1146 = vmatpush1.bf16.msra.mxu0 %v3154_v28  ;;  %1240 = vmatpush1.bf16.msra.mxu1 %v3236_v44 }
  0x53   : > { %1147 = vmatprep.subr.bf16.mxu0 %v3166_v30  ;;  %1241 = vmatprep.subr.bf16.mxu1 %v3243_v45 }
  0x56   : > { %1148 = vmatpush1.bf16.msra.mxu0 %v3178_v32  ;;  %1242 = vmatpush1.bf16.msra.mxu1 %v3252_v46 }
  0x57   : > { %1149 = vmatprep.subr.bf16.mxu0 %v3192_v34  ;;  %1243 = vmatprep.subr.bf16.mxu1 %v3259_v47 }
  0x5a   : > { %1150 = vmatpush1.bf16.msra.mxu0 %v3204_v36  ;;  %1244 = vmatpush1.bf16.msra.mxu1 %v3266_v48 }
  0x5b   : > { %1421 = vmatprep.subr.bf16.mxu0 %v2999_v0  ;;  %1505 = vmatprep.subr.bf16.mxu1 %v3005_v1 }
  0x5d   : > { %2687 = vmatmul.mubr.msk.bf16.vlgmr.msra.gmra.mxu0 %vm309_vm0, %v251_v50  ;;  %2704 = vmatmul.mubr.msk.bf16.vlgmr.msra.gmra.mxu1 %vm309_vm0, %v805_v52 }
  0x5e   : > { %1422 = vmatpush1.bf16.msra.mxu0 %v3013_v3  ;;  %1506 = vmatpush1.bf16.msra.mxu1 %v3018_v4 }
  0x5f   : > { %1423 = vmatprep.subr.bf16.mxu0 %v3024_v5  ;;  %1507 = vmatprep.subr.bf16.mxu1 %v3031_v6 }
  0x60   : > { %1445 = vmatprep.mubr.bf16.mxu0 %v2959_v2  ;;  %1529 = vmatprep.mubr.bf16.mxu1 %v2959_v2 }
  0x62   : > { %1424 = vmatpush1.bf16.msra.mxu0 %v3036_v7  ;;  %1508 = vmatpush1.bf16.msra.mxu1 %v3042_v8 }
  0x63   : > { %1425 = vmatprep.subr.bf16.mxu0 %v3048_v9  ;;  %1509 = vmatprep.subr.bf16.mxu1 %v3053_v10 }
  0x66   : > { %1426 = vmatpush1.bf16.msra.mxu0 %v3058_v11  ;;  %1510 = vmatpush1.bf16.msra.mxu1 %v3063_v12 }
  0x67   : > { %1427 = vmatprep.subr.bf16.mxu0 %v3070_v13  ;;  %1511 = vmatprep.subr.bf16.mxu1 %v3077_v14 }
  0x6a   : > { %1428 = vmatpush1.bf16.msra.mxu0 %v3092_v15  ;;  %1512 = vmatpush1.bf16.msra.mxu1 %v3097_v16 }
  0x6b   : > { %1597 = vmatprep.subr.bf16.mxu0 %v3108_v19  ;;  %1691 = vmatprep.subr.bf16.mxu1 %v3113_v20 }
  0x6d   : > { %2728 = vmatmul.mubr.msk.bf16.vlgmr.msra.gmra.mxu0 %vm309_vm0, %v3335_v55  ;;  %2737 = vmatmul.mubr.msk.bf16.vlgmr.msra.gmra.mxu1 %vm309_vm0, %v1344_v56 }
  0x6e   : > { %1598 = vmatpush1.bf16.msra.mxu0 %v3122_v23  ;;  %1692 = vmatpush1.bf16.msra.mxu1 %v3127_v24 }
  0x6f   : > { %1599 = vmatprep.subr.bf16.mxu0 %v3134_v25  ;;  %1693 = vmatprep.subr.bf16.mxu1 %v3139_v26 }
  0x70   : > { %1621 = vmatprep.mubr.bf16.mxu0 %v2959_v2  ;;  %1715 = vmatprep.mubr.bf16.mxu1 %v2959_v2 }
  0x72   : > { %1600 = vmatpush1.bf16.msra.mxu0 %v3149_v27  ;;  %1694 = vmatpush1.bf16.msra.mxu1 %v3154_v28 }
  0x73   : > { %1601 = vmatprep.subr.bf16.mxu0 %v3161_v29  ;;  %1695 = vmatprep.subr.bf16.mxu1 %v3166_v30 }
  0x76   : > { %1602 = vmatpush1.bf16.msra.mxu0 %v3173_v31  ;;  %1696 = vmatpush1.bf16.msra.mxu1 %v3178_v32 }
  0x77   : > { %1603 = vmatprep.subr.bf16.mxu0 %v3185_v33  ;;  %1697 = vmatprep.subr.bf16.mxu1 %v3192_v34 }
  0x7a   : > { %1604 = vmatpush1.bf16.msra.mxu0 %v3197_v35  ;;  %1698 = vmatpush1.bf16.msra.mxu1 %v3204_v36 }
  0x7b   : > { %1785 = vmatprep.subr.bf16.mxu0 %v3213_v39  ;;  %1967 = vmatprep.subr.bf16.mxu1 %v2999_v0  ;;  %v1899_v0 = vpack.c.bf16 %v2795_v63, %v2795_v63 }
  0x7d   : > { %2754 = vmatmul.mubr.msk.bf16.vlgmr.msra.gmra.mxu0 %vm309_vm0, %v1349_v59  ;;  %2771 = vmatmul.mubr.msk.bf16.vlgmr.msra.gmra.mxu1 %vm309_vm0, %v1351_v60 }
  0x7e   : > { %1786 = vmatpush1.bf16.msra.mxu0 %v3220_v42  ;;  %1968 = vmatpush1.bf16.msra.mxu1 %v3013_v3 }
  0x7f   : > { %1787 = vmatprep.subr.bf16.mxu0 %v3227_v43  ;;  %1969 = vmatprep.subr.bf16.mxu1 %v3024_v5 }
  0x80   : > { %1809 = vmatprep.mubr.bf16.mxu0 %v2959_v2  ;;  %1991 = vmatprep.mubr.bf16.mxu1 %v2959_v2 }
  0x82   : > { %1788 = vmatpush1.bf16.msra.mxu0 %v3236_v44  ;;  %1970 = vmatpush1.bf16.msra.mxu1 %v3036_v7 }
  0x83   : > { %1789 = vmatprep.subr.bf16.mxu0 %v3243_v45  ;;  %1971 = vmatprep.subr.bf16.mxu1 %v3048_v9 }
  0x86   : > { %1790 = vmatpush1.bf16.msra.mxu0 %v3252_v46  ;;  %1972 = vmatpush1.bf16.msra.mxu1 %v3058_v11 }
  0x87   : > { %1791 = vmatprep.subr.bf16.mxu0 %v3259_v47  ;;  %1973 = vmatprep.subr.bf16.mxu1 %v3070_v13 }
  0x8a   : > { %1792 = vmatpush1.bf16.msra.mxu0 %v3266_v48  ;;  %1974 = vmatpush1.bf16.msra.mxu1 %v3092_v15 }
  0x8b   : > { %2051 = vmatprep.subr.bf16.mxu0 %v3005_v1  ;;  %2143 = vmatprep.subr.bf16.mxu1 %v3108_v19 }
  0x8d   : > { %2788 = vmatmul.mubr.msk.bf16.vlgmr.msra.gmra.mxu0 %vm309_vm0, %v1353_v62  ;;  %2812 = vmatmul.mubr.msk.bf16.vlgmr.msra.gmra.mxu1 %vm309_vm0, %v1349_v59 }
  0x8e   : > { %2052 = vmatpush1.bf16.msra.mxu0 %v3018_v4  ;;  %2144 = vmatpush1.bf16.msra.mxu1 %v3122_v23 }
  0x8f   : > { %2053 = vmatprep.subr.bf16.mxu0 %v3031_v6  ;;  %2145 = vmatprep.subr.bf16.mxu1 %v3134_v25 }
  0x90   : > { %2075 = vmatprep.mubr.bf16.mxu0 %v2959_v2  ;;  %2167 = vmatprep.mubr.bf16.mxu1 %v2959_v2 }
  0x92   : > { %2054 = vmatpush1.bf16.msra.mxu0 %v3042_v8  ;;  %2146 = vmatpush1.bf16.msra.mxu1 %v3149_v27 }
  0x93   : > { %2055 = vmatprep.subr.bf16.mxu0 %v3053_v10  ;;  %2147 = vmatprep.subr.bf16.mxu1 %v3161_v29 }
  0x96   : > { %2056 = vmatpush1.bf16.msra.mxu0 %v3063_v12  ;;  %2148 = vmatpush1.bf16.msra.mxu1 %v3173_v31 }
  0x97   : > { %2057 = vmatprep.subr.bf16.mxu0 %v3077_v14  ;;  %2149 = vmatprep.subr.bf16.mxu1 %v3185_v33 }
  0x9a   : > { %2058 = vmatpush1.bf16.msra.mxu0 %v3097_v16  ;;  %2150 = vmatpush1.bf16.msra.mxu1 %v3197_v35 }
  0x9b   : > { %2237 = vmatprep.subr.bf16.mxu0 %v3113_v20  ;;  %2331 = vmatprep.subr.bf16.mxu1 %v3213_v39  ;;  %v744_v39 = vunpack.c.l.s4 %v2960_v38 }
  0x9d   : > { %2821 = vmatmul.mubr.msk.bf16.vlgmr.msra.gmra.mxu0 %vm309_vm0, %v3335_v55  ;;  %2838 = vmatmul.mubr.msk.bf16.vlgmr.msra.gmra.mxu1 %vm309_vm0, %v1351_v60 }
  0x9e   : > { %2238 = vmatpush1.bf16.msra.mxu0 %v3127_v24  ;;  %2332 = vmatpush1.bf16.msra.mxu1 %v3220_v42 }
  0x9f   : > { %2239 = vmatprep.subr.bf16.mxu0 %v3139_v26  ;;  %2333 = vmatprep.subr.bf16.mxu1 %v3227_v43 }
  0xa0   : > { %2261 = vmatprep.mubr.bf16.mxu0 %v2959_v2  ;;  %2355 = vmatprep.mubr.bf16.mxu1 %v2959_v2 }
  0xa2   : > { %2240 = vmatpush1.bf16.msra.mxu0 %v3154_v28  ;;  %2334 = vmatpush1.bf16.msra.mxu1 %v3236_v44 }
  0xa3   : > { %2241 = vmatprep.subr.bf16.mxu0 %v3166_v30  ;;  %2335 = vmatprep.subr.bf16.mxu1 %v3243_v45  ;;  %v745_v45 = vunpack.c.0.s8 %v744_v39 }
  0xa6   : > { %2242 = vmatpush1.bf16.msra.mxu0 %v3178_v32  ;;  %2336 = vmatpush1.bf16.msra.mxu1 %v3252_v46  ;;  %v747_v46 = vshrl.u32 %v746_v40, 7 }
  0xa7   : > { %2243 = vmatprep.subr.bf16.mxu0 %v3192_v34  ;;  %2337 = vmatprep.subr.bf16.mxu1 %v3259_v47 }
  0xa8   : > { %v3431_v51 = vsub.s32 %v745_v45, %v747_v46 }
  0xaa   : > { %2244 = vmatpush1.bf16.msra.mxu0 %v3204_v36  ;;  %2338 = vmatpush1.bf16.msra.mxu1 %v3266_v48 }
  0xad   : > { %2855 = vmatmul.mubr.msk.bf16.vlgmr.msra.gmra.mxu0 %vm309_vm0, %v1353_v62  ;;  %2872 = vmatmul.mubr.msk.bf16.vlgmr.msra.gmra.mxu1 %vm309_vm0, %v1899_v0 }
  0xdd   : > { %v347_v1 = vpop.f32.mrf.mxu0  ;;  %v431_v2 = vpop.f32.mrf.mxu1 }
  0xde   : > { %v432_v17 = vadd.f32 %v431_v2, %v347_v1 }
  0xdf   : > { %v349_v3 = vpop.f32.mrf.mxu0  ;;  %v433_v4 = vpop.f32.mrf.mxu1 }
  0xe0   : > { %v434_v18 = vadd.f32 %v433_v4, %v349_v3 }
  0xe1   : > { %v351_v5 = vpop.f32.mrf.mxu0  ;;  %v435_v6 = vpop.f32.mrf.mxu1 }
  0xe3   : > { %v352_v7 = vpop.f32.mrf.mxu0  ;;  %v436_v8 = vpop.f32.mrf.mxu1 }
  0xed   : > { %v524_v9 = vpop.f32.mrf.mxu0  ;;  %v619_v10 = vpop.f32.mrf.mxu1 }
  0xee   : > { %v531_v19 = vadd.f32 %v524_v9, %v432_v17 }
  0xef   : > { %v526_v11 = vpop.f32.mrf.mxu0  ;;  %v621_v12 = vpop.f32.mrf.mxu1 }
  0xf0   : > { %v532_v20 = vadd.f32 %v526_v11, %v434_v18  ;;  %v626_v21 = vadd.f32 %v619_v10, %v531_v19 }
  0xf1   : > { %v528_v13 = vpop.f32.mrf.mxu0  ;;  %v623_v14 = vpop.f32.mrf.mxu1 }
  0xf2   : > { %v627_v24 = vadd.f32 %v621_v12, %v532_v20 }
  0xf3   : > { %v529_v15 = vpop.f32.mrf.mxu0  ;;  %v624_v16 = vpop.f32.mrf.mxu1 }
  0xfd   : > { %v714_v22 = vpop.f32.mrf.mxu0  ;;  %v899_v23 = vpop.f32.mrf.mxu1 }
  0xfe   : > { %v721_v25 = vadd.f32 %v714_v22, %v626_v21 }
  0xff   : > { %v716_v26 = vpop.f32.mrf.mxu0  ;;  %v901_v27 = vpop.f32.mrf.mxu1 }
 0x100   : > { %v723_v28 = vrot.slane %v721_v25, 4  ;;  %v722_v29 = vadd.f32 %v716_v26, %v627_v24 }
 0x101   : > { %v718_v30 = vpop.f32.mrf.mxu0  ;;  %v903_v31 = vpop.f32.mrf.mxu1 }
 0x102   : > { %v724_v32 = vadd.f32 %v723_v28, %v721_v25  ;;  %v729_v33 = vrot.slane %v722_v29, 4 }
 0x103   : > { %v719_v34 = vpop.f32.mrf.mxu0  ;;  %v904_v35 = vpop.f32.mrf.mxu1 }
 0x104   : > { %v725_v36 = vrot.slane %v724_v32, 2  ;;  %v730_v37 = vadd.f32 %v729_v33, %v722_v29 }
 0x106   : > { %v726_v41 = vadd.f32 %v725_v36, %v724_v32  ;;  %v731_v42 = vrot.slane %v730_v37, 2 }
 0x108   : > { %v727_v43 = vrot.slane %v726_v41, 1  ;;  %v732_v44 = vadd.f32 %v731_v42, %v730_v37 }
 0x10a   : > { %v728_v47 = vadd.f32 %v727_v43, %v726_v41  ;;  %v733_v48 = vrot.slane %v732_v44, 1 }
 0x10c   : > { %v736_v49 = vmul.f32 0.125, %v728_v47  ;;  %v734_v50 = vadd.f32 %v733_v48, %v732_v44 }
 0x10d   : > { %v983_v52 = vpop.f32.mrf.mxu0  ;;  %v1075_v53 = vpop.f32.mrf.mxu1 }
 0x10e   : > { %v738_v54 = vsub.f32 %v721_v25, %v736_v49  ;;  %v737_v55 = vmul.f32 0.125, %v734_v50  ;;  %v742_v56 = vcombine.low %v728_v47, %v734_v50  ;;  %v984_v12 = vadd.f32 %v983_v52, %v899_v23 }
 0x10f   : > { %v985_v57 = vpop.f32.mrf.mxu0  ;;  %v1077_v58 = vpop.f32.mrf.mxu1 }
 0x110   : > { %v763_v59 = vmul.f32 %v738_v54, %v738_v54  ;;  %v739_v60 = vsub.f32 %v722_v29, %v737_v55  ;;  %v749_v61 = vrot.slane %v742_v56, %v3431_v51  ;;  %v986_v15 = vadd.f32 %v985_v57, %v901_v27 }
 0x111   : > { %v987_v63 = vpop.f32.mrf.mxu0  ;;  %v1079_v0 = vpop.f32.mrf.mxu1  ;;  %v1082_v17 = vadd.f32 %v1075_v53, %v984_v12 }
 0x112   : > { %v765_v1 = vrot.slane %v763_v59, 4  ;;  %v756_v2 = vrot.slane %v749_v61, %v3431_v51  ;;  %v764_v3 = vmul.f32 %v739_v60, %v739_v60  ;;  %v1083_v22 = vadd.f32 %v1077_v58, %v986_v15 }
 0x113   : > { %v988_v4 = vpop.f32.mrf.mxu0  ;;  %v1080_v5 = vpop.f32.mrf.mxu1 }
 0x114   : > { %v766_v6 = vadd.f32 %v765_v1, %v763_v59  ;;  %762 = vst.msk [vmem:[%s3440_s12] ss:$4 sm:$0x3] %vm3442_vm1, %v756_v2  ;;  %v771_v7 = vrot.slane %v764_v3, 4 }
 0x116   : > { %v767_v8 = vrot.slane %v766_v6, 2  ;;  %v772_v9 = vadd.f32 %v771_v7, %v764_v3 }
 0x118   : > { %v768_v10 = vadd.f32 %v767_v8, %v766_v6  ;;  %v773_v11 = vrot.slane %v772_v9, 2 }
 0x11a   : > { %v769_v13 = vrot.slane %v768_v10, 1  ;;  %v774_v14 = vadd.f32 %v773_v11, %v772_v9 }
 0x11c   : > { %v775_v16 = vrot.slane %v774_v14, 1  ;;  %v770_v20 = vadd.f32 %v769_v13, %v768_v10 }
 0x11d   : > { %v1169_v18 = vpop.f32.mrf.mxu0  ;;  %v1263_v19 = vpop.f32.mrf.mxu1 }
 0x11e   : > { %v776_v21 = vadd.f32 %v775_v16, %v774_v14  ;;  %v1176_v24 = vadd.f32 %v1169_v18, %v1082_v17 }
 0x11f   : > { %v1171_v25 = vpop.f32.mrf.mxu0  ;;  %v1265_v26 = vpop.f32.mrf.mxu1 }
 0x120   : > { %v779_v28 = vcombine.low %v770_v20, %v776_v21  ;;  %v1270_v29 = vadd.f32 %v1263_v19, %v1176_v24  ;;  %v1177_v30 = vadd.f32 %v1171_v25, %v1083_v22 }
 0x121   : > { %v1173_v31 = vpop.f32.mrf.mxu0  ;;  %v1267_v32 = vpop.f32.mrf.mxu1 }
 0x122   : > { %v786_v23 = vrot.slane %v779_v28, %v3431_v51  ;;  %v1272_v33 = vrot.slane %v1270_v29, 4  ;;  %v1271_v27 = vadd.f32 %v1265_v26, %v1177_v30 }
 0x123   : > { %v1174_v34 = vpop.f32.mrf.mxu0  ;;  %v1268_v35 = vpop.f32.mrf.mxu1 }
 0x124   : > { %v793_v36 = vrot.slane %v786_v23, %v3431_v51  ;;  %v1273_v37 = vadd.f32 %v1272_v33, %v1270_v29  ;;  %v1278_v38 = vrot.slane %v1271_v27, 4 }
 0x126   : > { %795 = vst.msk [vmem:[%s3456_s17] ss:$4 sm:$0x3] %vm3442_vm1, %v793_v36  ;;  %v1274_v39 = vrot.slane %v1273_v37, 2  ;;  %v1279_v40 = vadd.f32 %v1278_v38, %v1271_v27 }
 0x128   : > { %v1275_v41 = vadd.f32 %v1274_v39, %v1273_v37  ;;  %v1280_v42 = vrot.slane %v1279_v40, 2 }
 0x12a   : > { %v1276_v43 = vrot.slane %v1275_v41, 1  ;;  %v1281_v44 = vadd.f32 %v1280_v42, %v1279_v40 }
 0x12c   : > { %v1277_v45 = vadd.f32 %v1276_v43, %v1275_v41  ;;  %v1282_v46 = vrot.slane %v1281_v44, 1 }
 0x12d   : > { %v1447_v47 = vpop.f32.mrf.mxu0  ;;  %v1531_v48 = vpop.f32.mrf.mxu1 }
 0x12e   : > { %v1284_v49 = vmul.f32 0.125, %v1277_v45  ;;  %v1283_v50 = vadd.f32 %v1282_v46, %v1281_v44  ;;  %v1532_v28 = vadd.f32 %v1531_v48, %v1447_v47 }
 0x12f   : > { %v1449_v52 = vpop.f32.mrf.mxu0  ;;  %v1533_v53 = vpop.f32.mrf.mxu1 }
 0x130   : > { %v1286_v54 = vsub.f32 %v1270_v29, %v1284_v49  ;;  %v1285_v55 = vmul.f32 0.125, %v1283_v50  ;;  %v1290_v56 = vcombine.low %v1277_v45, %v1283_v50  ;;  %v1534_v29 = vadd.f32 %v1533_v53, %v1449_v52 }
 0x131   : > { %v1451_v57 = vpop.f32.mrf.mxu0  ;;  %v1535_v58 = vpop.f32.mrf.mxu1 }
 0x132   : > { %v1308_v59 = vmul.f32 %v1286_v54, %v1286_v54  ;;  %v1287_v60 = vsub.f32 %v1271_v27, %v1285_v55  ;;  %v1297_v61 = vrot.slane %v1290_v56, %v3431_v51 }
 0x133   : > { %v1452_v63 = vpop.f32.mrf.mxu0  ;;  %v1536_v0 = vpop.f32.mrf.mxu1 }
 0x134   : > { %v1310_v1 = vrot.slane %v1308_v59, 4  ;;  %v1304_v2 = vrot.slane %v1297_v61, %v3431_v51  ;;  %v1309_v3 = vmul.f32 %v1287_v60, %v1287_v60 }
 0x136   : > { %v1311_v4 = vadd.f32 %v1310_v1, %v1308_v59  ;;  %2705 = vst.msk [vmem:[%s3440_s12 + $0x1] ss:$4 sm:$0x3] %vm3442_vm1, %v1304_v2  ;;  %v1316_v5 = vrot.slane %v1309_v3, 4 }
 0x138   : > { %v1312_v6 = vrot.slane %v1311_v4, 2  ;;  %v1317_v7 = vadd.f32 %v1316_v5, %v1309_v3 }
 0x13a   : > { %v1313_v8 = vadd.f32 %v1312_v6, %v1311_v4  ;;  %v1318_v9 = vrot.slane %v1317_v7, 2 }
 0x13c   : > { %v1314_v10 = vrot.slane %v1313_v8, 1  ;;  %v1319_v11 = vadd.f32 %v1318_v9, %v1317_v7 }
 0x13d   : > { %v1623_v12 = vpop.f32.mrf.mxu0  ;;  %v1717_v13 = vpop.f32.mrf.mxu1 }
 0x13e   : > { %v1320_v14 = vrot.slane %v1319_v11, 1  ;;  %v1315_v17 = vadd.f32 %v1314_v10, %v1313_v8  ;;  %v1630_v30 = vadd.f32 %v1623_v12, %v1532_v28 }
 0x13f   : > { %v1625_v15 = vpop.f32.mrf.mxu0  ;;  %v1719_v16 = vpop.f32.mrf.mxu1 }
 0x140   : > { %v1321_v18 = vadd.f32 %v1320_v14, %v1319_v11  ;;  %v1631_v31 = vadd.f32 %v1625_v15, %v1534_v29  ;;  %v1724_v32 = vadd.f32 %v1717_v13, %v1630_v30 }
 0x141   : > { %v1627_v19 = vpop.f32.mrf.mxu0  ;;  %v1721_v20 = vpop.f32.mrf.mxu1 }
 0x142   : > { %v1324_v21 = vcombine.low %v1315_v17, %v1321_v18  ;;  %v1725_v27 = vadd.f32 %v1719_v16, %v1631_v31 }
 0x143   : > { %v1628_v22 = vpop.f32.mrf.mxu0  ;;  %v1722_v24 = vpop.f32.mrf.mxu1 }
 0x144   : > { %v1331_v25 = vrot.slane %v1324_v21, %v3431_v51 }
 0x146   : > { %v1338_v26 = vrot.slane %v1331_v25, %v3431_v51 }
 0x148   : > { %2706 = vst.msk [vmem:[%s3456_s17 + $0x1] ss:$4 sm:$0x3] %vm3442_vm1, %v1338_v26 }
 0x14d   : > { %v1811_v23 = vpop.f32.mrf.mxu0  ;;  %v1993_v33 = vpop.f32.mrf.mxu1 }
 0x14e   : > { %v1818_v34 = vadd.f32 %v1811_v23, %v1724_v32 }
 0x14f   : > { %v1813_v35 = vpop.f32.mrf.mxu0  ;;  %v1995_v36 = vpop.f32.mrf.mxu1 }
 0x150   : > { %v1820_v37 = vrot.slane %v1818_v34, 4  ;;  %v1819_v38 = vadd.f32 %v1813_v35, %v1725_v27 }
 0x151   : > { %v1815_v39 = vpop.f32.mrf.mxu0  ;;  %v1997_v40 = vpop.f32.mrf.mxu1 }
 0x152   : > { %v1821_v41 = vadd.f32 %v1820_v37, %v1818_v34  ;;  %v1826_v42 = vrot.slane %v1819_v38, 4 }
 0x153   : > { %v1816_v43 = vpop.f32.mrf.mxu0  ;;  %v1998_v44 = vpop.f32.mrf.mxu1 }
 0x154   : > { %v1822_v45 = vrot.slane %v1821_v41, 2  ;;  %v1827_v46 = vadd.f32 %v1826_v42, %v1819_v38 }
 0x156   : > { %v1823_v47 = vadd.f32 %v1822_v45, %v1821_v41  ;;  %v1828_v48 = vrot.slane %v1827_v46, 2 }
 0x158   : > { %v1824_v49 = vrot.slane %v1823_v47, 1  ;;  %v1829_v50 = vadd.f32 %v1828_v48, %v1827_v46 }
 0x15a   : > { %v1825_v52 = vadd.f32 %v1824_v49, %v1823_v47  ;;  %v1830_v53 = vrot.slane %v1829_v50, 1 }
 0x15c   : > { %v1832_v54 = vmul.f32 0.125, %v1825_v52  ;;  %v1831_v55 = vadd.f32 %v1830_v53, %v1829_v50 }
 0x15d   : > { %v2077_v56 = vpop.f32.mrf.mxu0  ;;  %v2169_v57 = vpop.f32.mrf.mxu1 }
 0x15e   : > { %v1834_v58 = vsub.f32 %v1818_v34, %v1832_v54  ;;  %v1833_v59 = vmul.f32 0.125, %v1831_v55  ;;  %v1838_v60 = vcombine.low %v1825_v52, %v1831_v55  ;;  %v2078_v16 = vadd.f32 %v2077_v56, %v1993_v33 }
 0x15f   : > { %v2079_v61 = vpop.f32.mrf.mxu0  ;;  %v2171_v63 = vpop.f32.mrf.mxu1 }
 0x160   : > { %v1856_v0 = vmul.f32 %v1834_v58, %v1834_v58  ;;  %v1835_v1 = vsub.f32 %v1819_v38, %v1833_v59  ;;  %v1845_v2 = vrot.slane %v1838_v60, %v3431_v51  ;;  %v2080_v19 = vadd.f32 %v2079_v61, %v1995_v36 }
 0x161   : > { %v2081_v3 = vpop.f32.mrf.mxu0  ;;  %v2173_v4 = vpop.f32.mrf.mxu1  ;;  %v2176_v21 = vadd.f32 %v2169_v57, %v2078_v16 }
 0x162   : > { %v1858_v5 = vrot.slane %v1856_v0, 4  ;;  %v1852_v6 = vrot.slane %v1845_v2, %v3431_v51  ;;  %v1857_v7 = vmul.f32 %v1835_v1, %v1835_v1  ;;  %v2177_v28 = vadd.f32 %v2171_v63, %v2080_v19 }
 0x163   : > { %v2082_v8 = vpop.f32.mrf.mxu0  ;;  %v2174_v9 = vpop.f32.mrf.mxu1 }
 0x164   : > { %v1859_v10 = vadd.f32 %v1858_v5, %v1856_v0  ;;  %2789 = vst.msk [vmem:[%s3440_s12 + $0x2] ss:$4 sm:$0x3] %vm3442_vm1, %v1852_v6  ;;  %v1864_v11 = vrot.slane %v1857_v7, 4 }
 0x166   : > { %v1860_v12 = vrot.slane %v1859_v10, 2  ;;  %v1865_v13 = vadd.f32 %v1864_v11, %v1857_v7 }
 0x168   : > { %v1861_v14 = vadd.f32 %v1860_v12, %v1859_v10  ;;  %v1866_v15 = vrot.slane %v1865_v13, 2 }
 0x16a   : > { %v1862_v17 = vrot.slane %v1861_v14, 1  ;;  %v1867_v18 = vadd.f32 %v1866_v15, %v1865_v13 }
 0x16c   : > { %v1868_v20 = vrot.slane %v1867_v18, 1  ;;  %v1863_v25 = vadd.f32 %v1862_v17, %v1861_v14 }
 0x16d   : > { %v2263_v22 = vpop.f32.mrf.mxu0  ;;  %v2357_v24 = vpop.f32.mrf.mxu1 }
 0x16e   : > { %v1869_v26 = vadd.f32 %v1868_v20, %v1867_v18  ;;  %v2270_v29 = vadd.f32 %v2263_v22, %v2176_v21 }
 0x16f   : > { %v2265_v30 = vpop.f32.mrf.mxu0  ;;  %v2359_v31 = vpop.f32.mrf.mxu1 }
 0x170   : > { %v1872_v32 = vcombine.low %v1863_v25, %v1869_v26  ;;  %v2364_v23 = vadd.f32 %v2357_v24, %v2270_v29  ;;  %v2271_v27 = vadd.f32 %v2265_v30, %v2177_v28 }
 0x171   : > { %v2267_v34 = vpop.f32.mrf.mxu0  ;;  %v2361_v35 = vpop.f32.mrf.mxu1 }
 0x172   : > { %v1879_v33 = vrot.slane %v1872_v32, %v3431_v51  ;;  %v2366_v37 = vrot.slane %v2364_v23, 4  ;;  %v2365_v36 = vadd.f32 %v2359_v31, %v2271_v27 }
 0x173   : > { %v2268_v38 = vpop.f32.mrf.mxu0  ;;  %v2362_v39 = vpop.f32.mrf.mxu1 }
 0x174   : > { %v1886_v40 = vrot.slane %v1879_v33, %v3431_v51  ;;  %v2367_v41 = vadd.f32 %v2366_v37, %v2364_v23  ;;  %v2372_v42 = vrot.slane %v2365_v36, 4 }
 0x176   : > { %2790 = vst.msk [vmem:[%s3456_s17 + $0x2] ss:$4 sm:$0x3] %vm3442_vm1, %v1886_v40  ;;  %v2368_v43 = vrot.slane %v2367_v41, 2  ;;  %v2373_v44 = vadd.f32 %v2372_v42, %v2365_v36 }
 0x178   : > { %v2369_v45 = vadd.f32 %v2368_v43, %v2367_v41  ;;  %v2374_v46 = vrot.slane %v2373_v44, 2 }
 0x17a   : > { %v2370_v47 = vrot.slane %v2369_v45, 1  ;;  %v2375_v48 = vadd.f32 %v2374_v46, %v2373_v44 }
 0x17c   : > { %v2371_v49 = vadd.f32 %v2370_v47, %v2369_v45  ;;  %v2376_v50 = vrot.slane %v2375_v48, 1 }
 0x17e   : > { %v2378_v52 = vmul.f32 0.125, %v2371_v49  ;;  %v2377_v53 = vadd.f32 %v2376_v50, %v2375_v48 }
 0x180   : > { %v2380_v54 = vsub.f32 %v2364_v23, %v2378_v52  ;;  %v2379_v55 = vmul.f32 0.125, %v2377_v53  ;;  %v2384_v56 = vcombine.low %v2371_v49, %v2377_v53 }
 0x182   : > { %v2402_v57 = vmul.f32 %v2380_v54, %v2380_v54  ;;  %v2381_v58 = vsub.f32 %v2365_v36, %v2379_v55  ;;  %v2391_v59 = vrot.slane %v2384_v56, %v3431_v51 }
 0x184   : > { %v2404_v60 = vrot.slane %v2402_v57, 4  ;;  %v2398_v61 = vrot.slane %v2391_v59, %v3431_v51  ;;  %v2403_v63 = vmul.f32 %v2381_v58, %v2381_v58 }
 0x186   : > { %v2405_v0 = vadd.f32 %v2404_v60, %v2402_v57  ;;  %2873 = vst.msk [vmem:[%s3440_s12 + $0x3] ss:$4 sm:$0x3] %vm3442_vm1, %v2398_v61  ;;  %v2410_v1 = vrot.slane %v2403_v63, 4 }
 0x188   : > { %v2406_v2 = vrot.slane %v2405_v0, 2  ;;  %v2411_v3 = vadd.f32 %v2410_v1, %v2403_v63 }
 0x18a   : > { %v2407_v4 = vadd.f32 %v2406_v2, %v2405_v0  ;;  %v2412_v5 = vrot.slane %v2411_v3, 2 }
 0x18c   : > { %v2408_v6 = vrot.slane %v2407_v4, 1  ;;  %v2413_v7 = vadd.f32 %v2412_v5, %v2411_v3 }
 0x18e   : > { %v2414_v8 = vrot.slane %v2413_v7, 1  ;;  %v2409_v9 = vadd.f32 %v2408_v6, %v2407_v4 }
 0x190   : > { %v2415_v10 = vadd.f32 %v2414_v8, %v2413_v7 }
 0x192   : > { %v2418_v11 = vcombine.low %v2409_v9, %v2415_v10 }
 0x194   : > { %v2425_v12 = vrot.slane %v2418_v11, %v3431_v51 }
 0x196   : > { %v2432_v13 = vrot.slane %v2425_v12, %v3431_v51 }
 0x198   : > { %2874 = vst.msk [vmem:[%s3456_s17 + $0x3] ss:$4 sm:$0x3] %vm3442_vm1, %v2432_v13 }
 0x199 PF: > { %s15_s15 = sadd.s32 1, %s2957_s15  }
 0x19a   : > { %p12_p5 = scmp.ge.s32.totalorder %s15_s15, 10  }
 0x19c   :  { %14 = sbr.rel (!%p12_p5) target bundleno = 1 (0x1), region = 89 }

// kernel: basic_ext_forward.3
= control target key start
LH: loop header
LB: loop body
LE: loop exit
PB: predicated region body
PF: predicated region fallthrough
CT: control target
= control target key end

     0   :  { %s2063_s18 = smov 0   ;;  %s2545_s0 = inlined_call_operand.vmem [shape: f32[16,10,64], index: 0, kind: input, shape index: {}]   ;;  %s2546_s1 = inlined_call_operand.vmem [shape: f32[16,10,64], index: 1, kind: input, shape index: {}]   ;;  %s2547_s2 = inlined_call_operand.vmem [shape: bf16[5,64,256], index: 2, kind: input, shape index: {}]   ;;  %s2548_s3 = inlined_call_operand.vmem [shape: f32[1,256], index: 3, kind: input, shape index: {}]   ;;  %s2549_s4 = inlined_call_operand.vmem [shape: f32[1,256], index: 4, kind: input, shape index: {}]   ;;  %s2550_s5 = inlined_call_operand.vmem [shape: f32[16,8,128], index: 5, kind: output, shape index: {}]  }
   0x1 LB: > { %s1767_s19 = sadd.s32 4294967295, %s2030_s18   ;;  %p1771_p0 = scmp.ge.s32.totalorder %s2030_s18, 1  ;;  %s2030_s18 = sphi %s2063_s18, %s15_s18  }
   0x2   : > { %p201_p1 = scmp.lt.s32.totalorder %s2030_s18, 9 }
   0x4   : > { %p202_p2 = pnand %p1771_p0, %p201_p1 }
   0x5   : > { %s1772_s22 = sshll.u32 (!%p202_p2), %s1767_s19, 1 }
   0x6   : > { %205 = sbr.rel (%p202_p2) target bundleno = 383 (0x17f), region = 40  ;;  %p237_p3 = scmp.lt.s32.totalorder (!%p202_p2), %s1772_s22, 15 }
   0xb   : > { %v2074_v0 = vld [vmem:[%s2547_s2 + $0x74] ss:$8 sps:$4 sm:$0xff]   ;;  %v2032_v2 = vmov 0   ;;  %v2087_v3 = vld [vmem:[%s2547_s2 + $0x70] ss:$8 sps:$4 sm:$0xff]   ;;  %s2552_s22 = smov (!%p237_p3, %s1772_s22), 15 }
   0xc   : > { %v2079_v1 = vld [vmem:[%s2547_s2 + $0x34] ss:$8 sps:$4 sm:$0xff]   ;;  %362 = vmatprep.mubr.bf16.mxu0 %v2032_v2  ;;  %446 = vmatprep.mubr.bf16.mxu1 %v2032_v2  ;;  %v2092_v4 = vld [vmem:[%s2547_s2 + $0x30] ss:$8 sps:$4 sm:$0xff]   ;;  %v2098_v5 = vld [vmem:[%s2547_s2 + $0x64] ss:$8 sps:$4 sm:$0xff]  }
   0xd   : > { %338 = vmatprep.subr.bf16.mxu0 %v2074_v0  ;;  %422 = vmatprep.subr.bf16.mxu1 %v2079_v1  ;;  %v2107_v6 = vld [vmem:[%s2547_s2 + $0x24] ss:$8 sps:$4 sm:$0xff]   ;;  %v2112_v7 = vld [vmem:[%s2547_s2 + $0x60] ss:$8 sps:$4 sm:$0xff]   ;;  %v2124_v9 = vld [vmem:[%s2547_s2 + $0x54] ss:$8 sps:$4 sm:$0xff]  }
   0xe   : > { %339 = vmatpush1.bf16.msra.mxu0 %v2087_v3  ;;  %423 = vmatpush1.bf16.msra.mxu1 %v2092_v4  ;;  %v2118_v8 = vld [vmem:[%s2547_s2 + $0x20] ss:$8 sps:$4 sm:$0xff]   ;;  %s1953_s14 = sshll.u32 %s2552_s22, 4  ;;  %v2130_v10 = vld [vmem:[%s2547_s2 + $0x14] ss:$8 sps:$4 sm:$0xff]   ;;  %vm326_vm0 = vcmask 523264  }
   0xf   : > { %340 = vmatprep.subr.bf16.mxu0 %v2098_v5  ;;  %424 = vmatprep.subr.bf16.mxu1 %v2107_v6  ;;  %v2135_v11 = vld [vmem:[%s2547_s2 + $0x50] ss:$8 sps:$4 sm:$0xff]   ;;  %v2147_v13 = vld [vmem:[%s2547_s2 + $0x44] ss:$8 sps:$4 sm:$0xff]   ;;  %s2159_s29 = scalar_lea.vmem %s2546_s1, %s1953_s14  ;;  %s2164_s7 = scalar_lea.vmem %s2545_s0, %s1953_s14  ;;  %v2169_v15 = vld [vmem:[%s2547_s2 + $0x40] ss:$8 sps:$4 sm:$0xff]  }
  0x10   : > { %v2140_v12 = vld [vmem:[%s2547_s2 + $0x10] ss:$8 sps:$4 sm:$0xff]   ;;  %v2154_v14 = vld [vmem:[%s2547_s2 + $0x4] ss:$8 sps:$4 sm:$0xff]   ;;  %v2174_v16 = vld [vmem:[%s2547_s2] ss:$8 sps:$4 sm:$0xff]  }
  0x11   : > { %v261_v17 = vld [vmem:[%s2159_s29] sm:$0xff]  ;;  %v2185_v19 = vld [vmem:[%s2547_s2 + $0xb4] ss:$8 sps:$4 sm:$0xff]   ;;  %v2199_v23 = vld [vmem:[%s2547_s2 + $0xb0] ss:$8 sps:$4 sm:$0xff]   ;;  %s1779_s21 = sshll.u32 %s2552_s22, 3 }
  0x12   : > { %341 = vmatpush1.bf16.msra.mxu0 %v2112_v7  ;;  %425 = vmatpush1.bf16.msra.mxu1 %v2118_v8  ;;  %v259_v18 = vld [vmem:[%s2164_s7] sm:$0xff]  ;;  %v2190_v20 = vld [vmem:[%s2547_s2 + $0xf4] ss:$8 sps:$4 sm:$0xff]   ;;  %v2192_v21 = vpack.c.bf16 %v261_v17, %v261_v17  ;;  %v2204_v24 = vld [vmem:[%s2547_s2 + $0xf0] ss:$8 sps:$4 sm:$0xff]   ;;  %s2530_s25 = scalar_lea.vmem %s2550_s5, %s1779_s21 }
  0x13   : > { %342 = vmatprep.subr.bf16.mxu0 %v2124_v9  ;;  %426 = vmatprep.subr.bf16.mxu1 %v2130_v10  ;;  %v260_v22 = vpack.c.bf16 %v259_v18, %v259_v18  ;;  %v2211_v25 = vld [vmem:[%s2547_s2 + $0xa4] ss:$8 sps:$4 sm:$0xff]   ;;  %v2226_v27 = vld [vmem:[%s2547_s2 + $0xa0] ss:$8 sps:$4 sm:$0xff]   ;;  %v2238_v29 = vld [vmem:[%s2547_s2 + $0x94] ss:$8 sps:$4 sm:$0xff]  }
  0x14   : > { %v2216_v26 = vld [vmem:[%s2547_s2 + $0xe4] ss:$8 sps:$4 sm:$0xff]   ;;  %v2231_v28 = vld [vmem:[%s2547_s2 + $0xe0] ss:$8 sps:$4 sm:$0xff]   ;;  %v2243_v30 = vld [vmem:[%s2547_s2 + $0xd4] ss:$8 sps:$4 sm:$0xff]  }
  0x15   : > { %v2250_v31 = vld [vmem:[%s2547_s2 + $0x90] ss:$8 sps:$4 sm:$0xff]   ;;  %v2262_v33 = vld [vmem:[%s2547_s2 + $0x84] ss:$8 sps:$4 sm:$0xff]   ;;  %v2274_v35 = vld [vmem:[%s2547_s2 + $0x80] ss:$8 sps:$4 sm:$0xff]  }
  0x16   : > { %343 = vmatpush1.bf16.msra.mxu0 %v2135_v11  ;;  %427 = vmatpush1.bf16.msra.mxu1 %v2140_v12  ;;  %v2255_v32 = vld [vmem:[%s2547_s2 + $0xd0] ss:$8 sps:$4 sm:$0xff]   ;;  %v2269_v34 = vld [vmem:[%s2547_s2 + $0xc4] ss:$8 sps:$4 sm:$0xff]   ;;  %v2281_v36 = vld [vmem:[%s2547_s2 + $0xc0] ss:$8 sps:$4 sm:$0xff]  }
  0x17   : > { %344 = vmatprep.subr.bf16.mxu0 %v2147_v13  ;;  %428 = vmatprep.subr.bf16.mxu1 %v2154_v14  ;;  %v263_v37 = vld [vmem:[%s2164_s7 + $0x1] sm:$0xff]  ;;  %v2290_v39 = vld [vmem:[%s2547_s2 + $0x134] ss:$8 sps:$4 sm:$0xff]   ;;  %v2297_v42 = vld [vmem:[%s2547_s2 + $0x130] ss:$8 sps:$4 sm:$0xff]  }
  0x18   : > { %v265_v38 = vld [vmem:[%s2159_s29 + $0x1] sm:$0xff]  ;;  %v264_v40 = vpack.c.bf16 %v263_v37, %v263_v37  ;;  %v2320_v45 = vld [vmem:[%s2547_s2 + $0x114] ss:$8 sps:$4 sm:$0xff]   ;;  %v2329_v46 = vld [vmem:[%s2547_s2 + $0x110] ss:$8 sps:$4 sm:$0xff]  }
  0x19   : > { %v266_v41 = vpack.c.bf16 %v265_v38, %v265_v38  ;;  %v2304_v43 = vld [vmem:[%s2547_s2 + $0x124] ss:$8 sps:$4 sm:$0xff]   ;;  %v2313_v44 = vld [vmem:[%s2547_s2 + $0x120] ss:$8 sps:$4 sm:$0xff]   ;;  %v1863_v53 = vld [vmem:[%s2159_s29 + $0x10] sm:$0xff] }
  0x1a   : > { %345 = vmatpush1.bf16.msra.mxu0 %v2169_v15  ;;  %429 = vmatpush1.bf16.msra.mxu1 %v2174_v16  ;;  %v2336_v47 = vld [vmem:[%s2547_s2 + $0x104] ss:$8 sps:$4 sm:$0xff]   ;;  %v2343_v48 = vld [vmem:[%s2547_s2 + $0x100] ss:$8 sps:$4 sm:$0xff]   ;;  %v1862_v54 = vld [vmem:[%s2164_s7 + $0x10] sm:$0xff]  ;;  %v2412_v55 = vpack.c.bf16 %v1863_v53, %v1863_v53 }
  0x1b   : > { %515 = vmatprep.subr.bf16.mxu0 %v2185_v19  ;;  %610 = vmatprep.subr.bf16.mxu1 %v2190_v20  ;;  %v267_v49 = vld [vmem:[%s2164_s7 + $0x2] sm:$0xff]  ;;  %v993_v56 = vpack.c.bf16 %v1862_v54, %v1862_v54  ;;  %v1864_v57 = vld [vmem:[%s2164_s7 + $0x11] sm:$0xff] }
  0x1c   : > { %v268_v50 = vpack.c.bf16 %v267_v49, %v267_v49  ;;  %v766_v51 = vld [vmem:[%s2159_s29 + $0x2] sm:$0xff]  ;;  %v1865_v58 = vld [vmem:[%s2159_s29 + $0x11] sm:$0xff]  ;;  %v998_v59 = vpack.c.bf16 %v1864_v57, %v1864_v57 }
  0x1d   : > { %1796 = vmatmul.mubr.msk.bf16.vlgmr.msra.gmra.mxu0 %vm326_vm0, %v2192_v21  ;;  %1805 = vmatmul.mubr.msk.bf16.vlgmr.msra.gmra.mxu1 %vm326_vm0, %v260_v22  ;;  %v767_v52 = vpack.c.bf16 %v766_v51, %v766_v51  ;;  %v1000_v60 = vpack.c.bf16 %v1865_v58, %v1865_v58  ;;  %v1866_v61 = vld [vmem:[%s2164_s7 + $0x12] sm:$0xff]  ;;  %v258_v51 = vld [vmem:[%s2549_s4] sm:$0x3] }
  0x1e   : > { %516 = vmatpush1.bf16.msra.mxu0 %v2199_v23  ;;  %611 = vmatpush1.bf16.msra.mxu1 %v2204_v24  ;;  %v1002_v62 = vpack.c.bf16 %v1866_v61, %v1866_v61  ;;  %v1944_v63 = vld [vmem:[%s2159_s29 + $0x12] sm:$0xff] }
  0x1f   : > { %517 = vmatprep.subr.bf16.mxu0 %v2211_v25  ;;  %612 = vmatprep.subr.bf16.mxu1 %v2216_v26 }
  0x20   : > { %539 = vmatprep.mubr.bf16.mxu0 %v2032_v2  ;;  %634 = vmatprep.mubr.bf16.mxu1 %v2032_v2 }
  0x22   : > { %518 = vmatpush1.bf16.msra.mxu0 %v2226_v27  ;;  %613 = vmatpush1.bf16.msra.mxu1 %v2231_v28 }
  0x23   : > { %519 = vmatprep.subr.bf16.mxu0 %v2238_v29  ;;  %614 = vmatprep.subr.bf16.mxu1 %v2243_v30 }
  0x26   : > { %520 = vmatpush1.bf16.msra.mxu0 %v2250_v31  ;;  %615 = vmatpush1.bf16.msra.mxu1 %v2255_v32 }
  0x27   : > { %521 = vmatprep.subr.bf16.mxu0 %v2262_v33  ;;  %616 = vmatprep.subr.bf16.mxu1 %v2269_v34 }
  0x2a   : > { %522 = vmatpush1.bf16.msra.mxu0 %v2274_v35  ;;  %617 = vmatpush1.bf16.msra.mxu1 %v2281_v36 }
  0x2b   : > { %705 = vmatprep.subr.bf16.mxu0 %v2290_v39  ;;  %776 = vmatprep.subr.bf16.mxu1 %v2074_v0 }
  0x2d   : > { %1822 = vmatmul.mubr.msk.bf16.vlgmr.msra.gmra.mxu0 %vm326_vm0, %v264_v40  ;;  %1839 = vmatmul.mubr.msk.bf16.vlgmr.msra.gmra.mxu1 %vm326_vm0, %v266_v41 }
  0x2e   : > { %706 = vmatpush1.bf16.msra.mxu0 %v2297_v42  ;;  %777 = vmatpush1.bf16.msra.mxu1 %v2087_v3 }
  0x2f   : > { %707 = vmatprep.subr.bf16.mxu0 %v2304_v43  ;;  %778 = vmatprep.subr.bf16.mxu1 %v2098_v5 }
  0x30   : > { %729 = vmatprep.mubr.bf16.mxu0 %v2032_v2  ;;  %800 = vmatprep.mubr.bf16.mxu1 %v2032_v2 }
  0x32   : > { %708 = vmatpush1.bf16.msra.mxu0 %v2313_v44  ;;  %779 = vmatpush1.bf16.msra.mxu1 %v2112_v7 }
  0x33   : > { %709 = vmatprep.subr.bf16.mxu0 %v2320_v45  ;;  %780 = vmatprep.subr.bf16.mxu1 %v2124_v9 }
  0x36   : > { %710 = vmatpush1.bf16.msra.mxu0 %v2329_v46  ;;  %781 = vmatpush1.bf16.msra.mxu1 %v2135_v11 }
  0x37   : > { %711 = vmatprep.subr.bf16.mxu0 %v2336_v47  ;;  %782 = vmatprep.subr.bf16.mxu1 %v2147_v13 }
  0x3a   : > { %712 = vmatpush1.bf16.msra.mxu0 %v2343_v48  ;;  %783 = vmatpush1.bf16.msra.mxu1 %v2169_v15 }
  0x3b   : > { %817 = vmatprep.subr.bf16.mxu0 %v2079_v1  ;;  %858 = vmatprep.subr.bf16.mxu1 %v2185_v19 }
  0x3d   : > { %1856 = vmatmul.mubr.msk.bf16.vlgmr.msra.gmra.mxu0 %vm326_vm0, %v268_v50  ;;  %1857 = vmatmul.mubr.msk.bf16.vlgmr.msra.gmra.mxu1 %vm326_vm0, %v264_v40 }
  0x3e   : > { %818 = vmatpush1.bf16.msra.mxu0 %v2092_v4  ;;  %859 = vmatpush1.bf16.msra.mxu1 %v2199_v23 }
  0x3f   : > { %819 = vmatprep.subr.bf16.mxu0 %v2107_v6  ;;  %860 = vmatprep.subr.bf16.mxu1 %v2211_v25 }
  0x40   : > { %841 = vmatprep.mubr.bf16.mxu0 %v2032_v2  ;;  %882 = vmatprep.mubr.bf16.mxu1 %v2032_v2 }
  0x42   : > { %820 = vmatpush1.bf16.msra.mxu0 %v2118_v8  ;;  %861 = vmatpush1.bf16.msra.mxu1 %v2226_v27 }
  0x43   : > { %821 = vmatprep.subr.bf16.mxu0 %v2130_v10  ;;  %862 = vmatprep.subr.bf16.mxu1 %v2238_v29 }
  0x46   : > { %822 = vmatpush1.bf16.msra.mxu0 %v2140_v12  ;;  %863 = vmatpush1.bf16.msra.mxu1 %v2250_v31 }
  0x47   : > { %823 = vmatprep.subr.bf16.mxu0 %v2154_v14  ;;  %864 = vmatprep.subr.bf16.mxu1 %v2262_v33 }
  0x4a   : > { %824 = vmatpush1.bf16.msra.mxu0 %v2174_v16  ;;  %865 = vmatpush1.bf16.msra.mxu1 %v2274_v35 }
  0x4b   : > { %901 = vmatprep.subr.bf16.mxu0 %v2190_v20  ;;  %947 = vmatprep.subr.bf16.mxu1 %v2290_v39 }
  0x4d   : > { %1858 = vmatmul.mubr.msk.bf16.vlgmr.msra.gmra.mxu0 %vm326_vm0, %v2192_v21  ;;  %1859 = vmatmul.mubr.msk.bf16.vlgmr.msra.gmra.mxu1 %vm326_vm0, %v266_v41 }
  0x4e   : > { %902 = vmatpush1.bf16.msra.mxu0 %v2204_v24  ;;  %948 = vmatpush1.bf16.msra.mxu1 %v2297_v42 }
  0x4f   : > { %903 = vmatprep.subr.bf16.mxu0 %v2216_v26  ;;  %949 = vmatprep.subr.bf16.mxu1 %v2304_v43 }
  0x50   : > { %925 = vmatprep.mubr.bf16.mxu0 %v2032_v2  ;;  %971 = vmatprep.mubr.bf16.mxu1 %v2032_v2 }
  0x52   : > { %904 = vmatpush1.bf16.msra.mxu0 %v2231_v28  ;;  %950 = vmatpush1.bf16.msra.mxu1 %v2313_v44 }
  0x53   : > { %905 = vmatprep.subr.bf16.mxu0 %v2243_v30  ;;  %951 = vmatprep.subr.bf16.mxu1 %v2320_v45 }
  0x56   : > { %906 = vmatpush1.bf16.msra.mxu0 %v2255_v32  ;;  %952 = vmatpush1.bf16.msra.mxu1 %v2329_v46 }
  0x57   : > { %907 = vmatprep.subr.bf16.mxu0 %v2269_v34  ;;  %953 = vmatprep.subr.bf16.mxu1 %v2336_v47 }
  0x5a   : > { %908 = vmatpush1.bf16.msra.mxu0 %v2281_v36  ;;  %954 = vmatpush1.bf16.msra.mxu1 %v2343_v48 }
  0x5b   : > { %1070 = vmatprep.subr.bf16.mxu0 %v2074_v0  ;;  %1154 = vmatprep.subr.bf16.mxu1 %v2079_v1 }
  0x5d   : > { %1860 = vmatmul.mubr.msk.bf16.vlgmr.msra.gmra.mxu0 %vm326_vm0, %v268_v50  ;;  %1861 = vmatmul.mubr.msk.bf16.vlgmr.msra.gmra.mxu1 %vm326_vm0, %v767_v52 }
  0x5e   : > { %1071 = vmatpush1.bf16.msra.mxu0 %v2087_v3  ;;  %1155 = vmatpush1.bf16.msra.mxu1 %v2092_v4 }
  0x5f   : > { %1072 = vmatprep.subr.bf16.mxu0 %v2098_v5  ;;  %1156 = vmatprep.subr.bf16.mxu1 %v2107_v6 }
  0x60   : > { %1094 = vmatprep.mubr.bf16.mxu0 %v2032_v2  ;;  %1178 = vmatprep.mubr.bf16.mxu1 %v2032_v2 }
  0x62   : > { %1073 = vmatpush1.bf16.msra.mxu0 %v2112_v7  ;;  %1157 = vmatpush1.bf16.msra.mxu1 %v2118_v8 }
  0x63   : > { %1074 = vmatprep.subr.bf16.mxu0 %v2124_v9  ;;  %1158 = vmatprep.subr.bf16.mxu1 %v2130_v10 }
  0x66   : > { %1075 = vmatpush1.bf16.msra.mxu0 %v2135_v11  ;;  %1159 = vmatpush1.bf16.msra.mxu1 %v2140_v12 }
  0x67   : > { %1076 = vmatprep.subr.bf16.mxu0 %v2147_v13  ;;  %1160 = vmatprep.subr.bf16.mxu1 %v2154_v14 }
  0x6a   : > { %1077 = vmatpush1.bf16.msra.mxu0 %v2169_v15  ;;  %1161 = vmatpush1.bf16.msra.mxu1 %v2174_v16 }
  0x6b   : > { %1246 = vmatprep.subr.bf16.mxu0 %v2185_v19  ;;  %1340 = vmatprep.subr.bf16.mxu1 %v2190_v20 }
  0x6d   : > { %1883 = vmatmul.mubr.msk.bf16.vlgmr.msra.gmra.mxu0 %vm326_vm0, %v2412_v55  ;;  %1892 = vmatmul.mubr.msk.bf16.vlgmr.msra.gmra.mxu1 %vm326_vm0, %v993_v56 }
  0x6e   : > { %1247 = vmatpush1.bf16.msra.mxu0 %v2199_v23  ;;  %1341 = vmatpush1.bf16.msra.mxu1 %v2204_v24 }
  0x6f   : > { %1248 = vmatprep.subr.bf16.mxu0 %v2211_v25  ;;  %1342 = vmatprep.subr.bf16.mxu1 %v2216_v26 }
  0x70   : > { %1270 = vmatprep.mubr.bf16.mxu0 %v2032_v2  ;;  %1364 = vmatprep.mubr.bf16.mxu1 %v2032_v2 }
  0x72   : > { %1249 = vmatpush1.bf16.msra.mxu0 %v2226_v27  ;;  %1343 = vmatpush1.bf16.msra.mxu1 %v2231_v28 }
  0x73   : > { %1250 = vmatprep.subr.bf16.mxu0 %v2238_v29  ;;  %1344 = vmatprep.subr.bf16.mxu1 %v2243_v30 }
  0x76   : > { %1251 = vmatpush1.bf16.msra.mxu0 %v2250_v31  ;;  %1345 = vmatpush1.bf16.msra.mxu1 %v2255_v32 }
  0x77   : > { %1252 = vmatprep.subr.bf16.mxu0 %v2262_v33  ;;  %1346 = vmatprep.subr.bf16.mxu1 %v2269_v34 }
  0x7a   : > { %1253 = vmatpush1.bf16.msra.mxu0 %v2274_v35  ;;  %1347 = vmatpush1.bf16.msra.mxu1 %v2281_v36 }
  0x7b   : > { %1434 = vmatprep.subr.bf16.mxu0 %v2290_v39  ;;  %1483 = vmatprep.subr.bf16.mxu1 %v2074_v0  ;;  %v1474_v0 = vpack.c.bf16 %v1944_v63, %v1944_v63 }
  0x7d   : > { %1909 = vmatmul.mubr.msk.bf16.vlgmr.msra.gmra.mxu0 %vm326_vm0, %v998_v59  ;;  %1926 = vmatmul.mubr.msk.bf16.vlgmr.msra.gmra.mxu1 %vm326_vm0, %v1000_v60 }
  0x7e   : > { %1435 = vmatpush1.bf16.msra.mxu0 %v2297_v42  ;;  %1484 = vmatpush1.bf16.msra.mxu1 %v2087_v3 }
  0x7f   : > { %1436 = vmatprep.subr.bf16.mxu0 %v2304_v43  ;;  %1485 = vmatprep.subr.bf16.mxu1 %v2098_v5 }
  0x80   : > { %1458 = vmatprep.mubr.bf16.mxu0 %v2032_v2  ;;  %1507 = vmatprep.mubr.bf16.mxu1 %v2032_v2 }
  0x82   : > { %1437 = vmatpush1.bf16.msra.mxu0 %v2313_v44  ;;  %1486 = vmatpush1.bf16.msra.mxu1 %v2112_v7 }
  0x83   : > { %1438 = vmatprep.subr.bf16.mxu0 %v2320_v45  ;;  %1487 = vmatprep.subr.bf16.mxu1 %v2124_v9 }
  0x86   : > { %1439 = vmatpush1.bf16.msra.mxu0 %v2329_v46  ;;  %1488 = vmatpush1.bf16.msra.mxu1 %v2135_v11 }
  0x87   : > { %1440 = vmatprep.subr.bf16.mxu0 %v2336_v47  ;;  %1489 = vmatprep.subr.bf16.mxu1 %v2147_v13 }
  0x8a   : > { %1441 = vmatpush1.bf16.msra.mxu0 %v2343_v48  ;;  %1490 = vmatpush1.bf16.msra.mxu1 %v2169_v15 }
  0x8b   : > { %1524 = vmatprep.subr.bf16.mxu0 %v2079_v1  ;;  %1565 = vmatprep.subr.bf16.mxu1 %v2185_v19 }
  0x8d   : > { %1943 = vmatmul.mubr.msk.bf16.vlgmr.msra.gmra.mxu0 %vm326_vm0, %v1002_v62  ;;  %1945 = vmatmul.mubr.msk.bf16.vlgmr.msra.gmra.mxu1 %vm326_vm0, %v998_v59 }
  0x8e   : > { %1525 = vmatpush1.bf16.msra.mxu0 %v2092_v4  ;;  %1566 = vmatpush1.bf16.msra.mxu1 %v2199_v23 }
  0x8f   : > { %1526 = vmatprep.subr.bf16.mxu0 %v2107_v6  ;;  %1567 = vmatprep.subr.bf16.mxu1 %v2211_v25 }
  0x90   : > { %1548 = vmatprep.mubr.bf16.mxu0 %v2032_v2  ;;  %1589 = vmatprep.mubr.bf16.mxu1 %v2032_v2 }
  0x92   : > { %1527 = vmatpush1.bf16.msra.mxu0 %v2118_v8  ;;  %1568 = vmatpush1.bf16.msra.mxu1 %v2226_v27 }
  0x93   : > { %1528 = vmatprep.subr.bf16.mxu0 %v2130_v10  ;;  %1569 = vmatprep.subr.bf16.mxu1 %v2238_v29  ;;  %v741_v29 = vlaneseq }
  0x96   : > { %1529 = vmatpush1.bf16.msra.mxu0 %v2140_v12  ;;  %1570 = vmatpush1.bf16.msra.mxu1 %v2250_v31 }
  0x97   : > { %1530 = vmatprep.subr.bf16.mxu0 %v2154_v14  ;;  %1571 = vmatprep.subr.bf16.mxu1 %v2262_v33 }
  0x9a   : > { %1531 = vmatpush1.bf16.msra.mxu0 %v2174_v16  ;;  %1572 = vmatpush1.bf16.msra.mxu1 %v2274_v35 }
  0x9b   : > { %1608 = vmatprep.subr.bf16.mxu0 %v2190_v20  ;;  %1654 = vmatprep.subr.bf16.mxu1 %v2290_v39 }
  0x9d   : > { %1946 = vmatmul.mubr.msk.bf16.vlgmr.msra.gmra.mxu0 %vm326_vm0, %v2412_v55  ;;  %1947 = vmatmul.mubr.msk.bf16.vlgmr.msra.gmra.mxu1 %vm326_vm0, %v1000_v60 }
  0x9e   : > { %1609 = vmatpush1.bf16.msra.mxu0 %v2204_v24  ;;  %1655 = vmatpush1.bf16.msra.mxu1 %v2297_v42  ;;  %v257_v42 = vld [vmem:[%s2548_s3] sm:$0x3] }
  0x9f   : > { %1610 = vmatprep.subr.bf16.mxu0 %v2216_v26  ;;  %1656 = vmatprep.subr.bf16.mxu1 %v2304_v43 }
  0xa0   : > { %1632 = vmatprep.mubr.bf16.mxu0 %v2032_v2  ;;  %1678 = vmatprep.mubr.bf16.mxu1 %v2032_v2 }
  0xa2   : > { %1611 = vmatpush1.bf16.msra.mxu0 %v2231_v28  ;;  %1657 = vmatpush1.bf16.msra.mxu1 %v2313_v44 }
  0xa3   : > { %1612 = vmatprep.subr.bf16.mxu0 %v2243_v30  ;;  %1658 = vmatprep.subr.bf16.mxu1 %v2320_v45 }
  0xa6   : > { %1613 = vmatpush1.bf16.msra.mxu0 %v2255_v32  ;;  %1659 = vmatpush1.bf16.msra.mxu1 %v2329_v46 }
  0xa7   : > { %1614 = vmatprep.subr.bf16.mxu0 %v2269_v34  ;;  %1660 = vmatprep.subr.bf16.mxu1 %v2336_v47  ;;  %v742_v34 = vshrl.u32 %v741_v29, 7 }
  0xa9   : > { %v743_v40 = vsub.s32 0, %v742_v34  ;;  %v747_v41 = vsub.s32 1, %v742_v34 }
  0xaa   : > { %1615 = vmatpush1.bf16.msra.mxu0 %v2281_v36  ;;  %1661 = vmatpush1.bf16.msra.mxu1 %v2343_v48 }
  0xab   : > { %v2507_v47 = vrot.slane %v257_v42, %v743_v40  ;;  %v2509_v48 = vrot.slane %v257_v42, %v747_v41  ;;  %v2514_v60 = vrot.slane %v258_v51, %v743_v40  ;;  %v2516_v61 = vrot.slane %v258_v51, %v747_v41 }
  0xad   : > { %1948 = vmatmul.mubr.msk.bf16.vlgmr.msra.gmra.mxu0 %vm326_vm0, %v1002_v62  ;;  %1949 = vmatmul.mubr.msk.bf16.vlgmr.msra.gmra.mxu1 %vm326_vm0, %v1474_v0 }
  0xdd   : > { %v364_v1 = vpop.f32.mrf.mxu0  ;;  %v448_v2 = vpop.f32.mrf.mxu1 }
  0xde   : > { %v449_v35 = vadd.f32 %v448_v2, %v364_v1 }
  0xdf   : > { %v366_v3 = vpop.f32.mrf.mxu0  ;;  %v450_v4 = vpop.f32.mrf.mxu1 }
  0xe0   : > { %v451_v36 = vadd.f32 %v450_v4, %v366_v3 }
  0xe1   : > { %v368_v5 = vpop.f32.mrf.mxu0  ;;  %v452_v6 = vpop.f32.mrf.mxu1 }
  0xe3   : > { %v369_v7 = vpop.f32.mrf.mxu0  ;;  %v453_v8 = vpop.f32.mrf.mxu1 }
  0xed   : > { %v541_v9 = vpop.f32.mrf.mxu0  ;;  %v636_v10 = vpop.f32.mrf.mxu1 }
  0xee   : > { %v548_v37 = vadd.f32 %v541_v9, %v449_v35 }
  0xef   : > { %v543_v11 = vpop.f32.mrf.mxu0  ;;  %v638_v12 = vpop.f32.mrf.mxu1 }
  0xf0   : > { %v549_v38 = vadd.f32 %v543_v11, %v451_v36  ;;  %v643_v44 = vadd.f32 %v636_v10, %v548_v37 }
  0xf1   : > { %v545_v13 = vpop.f32.mrf.mxu0  ;;  %v640_v14 = vpop.f32.mrf.mxu1 }
  0xf2   : > { %v644_v45 = vadd.f32 %v638_v12, %v549_v38 }
  0xf3   : > { %v546_v15 = vpop.f32.mrf.mxu0  ;;  %v641_v16 = vpop.f32.mrf.mxu1 }
  0xfd   : > { %v731_v17 = vpop.f32.mrf.mxu0  ;;  %v802_v18 = vpop.f32.mrf.mxu1 }
  0xfe   : > { %v738_v52 = vadd.f32 %v731_v17, %v643_v44 }
  0xff   : > { %v733_v19 = vpop.f32.mrf.mxu0  ;;  %v804_v20 = vpop.f32.mrf.mxu1 }
 0x100   : > { %v739_v53 = vadd.f32 %v733_v19, %v644_v45  ;;  %v751_v0 = vmul.f32 %v2507_v47, %v738_v52 }
 0x101   : > { %v735_v21 = vpop.f32.mrf.mxu0  ;;  %v806_v22 = vpop.f32.mrf.mxu1 }
 0x102   : > { %v752_v1 = vmul.f32 %v2509_v48, %v739_v53  ;;  %v764_v8 = vadd.f32 %v2514_v60, %v751_v0 }
 0x103   : > { %v736_v23 = vpop.f32.mrf.mxu0  ;;  %v807_v24 = vpop.f32.mrf.mxu1 }
 0x104   : > { %v765_v9 = vadd.f32 %v2516_v61, %v752_v1 }
 0x10d   : > { %v843_v25 = vpop.f32.mrf.mxu0  ;;  %v884_v26 = vpop.f32.mrf.mxu1 }
 0x10e   : > { %v844_v39 = vadd.f32 %v843_v25, %v802_v18 }
 0x10f   : > { %v845_v27 = vpop.f32.mrf.mxu0  ;;  %v886_v28 = vpop.f32.mrf.mxu1 }
 0x110   : > { %v846_v43 = vadd.f32 %v845_v27, %v804_v20  ;;  %v891_v46 = vadd.f32 %v884_v26, %v844_v39 }
 0x111   : > { %v847_v30 = vpop.f32.mrf.mxu0  ;;  %v888_v31 = vpop.f32.mrf.mxu1 }
 0x112   : > { %v892_v54 = vadd.f32 %v886_v28, %v846_v43 }
 0x113   : > { %v848_v32 = vpop.f32.mrf.mxu0  ;;  %v889_v33 = vpop.f32.mrf.mxu1 }
 0x11d   : > { %v927_v49 = vpop.f32.mrf.mxu0  ;;  %v973_v50 = vpop.f32.mrf.mxu1 }
 0x11e   : > { %v934_v55 = vadd.f32 %v927_v49, %v891_v46 }
 0x11f   : > { %v929_v56 = vpop.f32.mrf.mxu0  ;;  %v975_v57 = vpop.f32.mrf.mxu1 }
 0x120   : > { %v980_v58 = vadd.f32 %v973_v50, %v934_v55  ;;  %v935_v59 = vadd.f32 %v929_v56, %v892_v54 }
 0x121   : > { %v931_v62 = vpop.f32.mrf.mxu0  ;;  %v977_v63 = vpop.f32.mrf.mxu1 }
 0x122   : > { %v982_v2 = vmul.f32 %v980_v58, %v2507_v47  ;;  %v981_v3 = vadd.f32 %v975_v57, %v935_v59 }
 0x123   : > { %v932_v4 = vpop.f32.mrf.mxu0  ;;  %v978_v5 = vpop.f32.mrf.mxu1 }
 0x124   : > { %v984_v6 = vadd.f32 %v982_v2, %v2514_v60  ;;  %v983_v7 = vmul.f32 %v981_v3, %v2509_v48 }
 0x126   : > { %v985_v10 = vadd.f32 %v983_v7, %v2516_v61  ;;  %v986_v11 = vmax.f32 %v764_v8, %v984_v6 }
 0x128   : > { %v987_v12 = vmax.f32 %v765_v9, %v985_v10 }
 0x12a   : > { %v988_v13 = vmax.f32 %v986_v11, %v987_v12 }
 0x12c   : > { %v989_v14 = vmax.f32 %v988_v13, 0.0 }
 0x12d   : > { %v1096_v15 = vpop.f32.mrf.mxu0  ;;  %v1180_v16 = vpop.f32.mrf.mxu1 }
 0x12e   : > { %990 = vst [vmem:[%s2530_s25] sm:$0xff] %v989_v14  ;;  %v1181_v49 = vadd.f32 %v1180_v16, %v1096_v15 }
 0x12f   : > { %v1098_v17 = vpop.f32.mrf.mxu0  ;;  %v1182_v18 = vpop.f32.mrf.mxu1 }
 0x130   : > { %v1183_v50 = vadd.f32 %v1182_v18, %v1098_v17 }
 0x131   : > { %v1100_v19 = vpop.f32.mrf.mxu0  ;;  %v1184_v20 = vpop.f32.mrf.mxu1 }
 0x133   : > { %v1101_v21 = vpop.f32.mrf.mxu0  ;;  %v1185_v22 = vpop.f32.mrf.mxu1 }
 0x13d   : > { %v1272_v23 = vpop.f32.mrf.mxu0  ;;  %v1366_v24 = vpop.f32.mrf.mxu1 }
 0x13e   : > { %v1279_v51 = vadd.f32 %v1272_v23, %v1181_v49 }
 0x13f   : > { %v1274_v25 = vpop.f32.mrf.mxu0  ;;  %v1368_v26 = vpop.f32.mrf.mxu1 }
 0x140   : > { %v1280_v52 = vadd.f32 %v1274_v25, %v1183_v50  ;;  %v1373_v55 = vadd.f32 %v1366_v24, %v1279_v51 }
 0x141   : > { %v1276_v27 = vpop.f32.mrf.mxu0  ;;  %v1370_v28 = vpop.f32.mrf.mxu1 }
 0x142   : > { %v1374_v56 = vadd.f32 %v1368_v26, %v1280_v52 }
 0x143   : > { %v1277_v29 = vpop.f32.mrf.mxu0  ;;  %v1371_v30 = vpop.f32.mrf.mxu1 }
 0x14d   : > { %v1460_v31 = vpop.f32.mrf.mxu0  ;;  %v1509_v32 = vpop.f32.mrf.mxu1 }
 0x14e   : > { %v1467_v62 = vadd.f32 %v1460_v31, %v1373_v55 }
 0x14f   : > { %v1462_v33 = vpop.f32.mrf.mxu0  ;;  %v1511_v34 = vpop.f32.mrf.mxu1 }
 0x150   : > { %v1468_v63 = vadd.f32 %v1462_v33, %v1374_v56  ;;  %v1469_v8 = vmul.f32 %v1467_v62, %v2507_v47 }
 0x151   : > { %v1464_v35 = vpop.f32.mrf.mxu0  ;;  %v1513_v36 = vpop.f32.mrf.mxu1 }
 0x152   : > { %v1470_v9 = vmul.f32 %v1468_v63, %v2509_v48  ;;  %v1471_v16 = vadd.f32 %v1469_v8, %v2514_v60 }
 0x153   : > { %v1465_v37 = vpop.f32.mrf.mxu0  ;;  %v1514_v38 = vpop.f32.mrf.mxu1 }
 0x154   : > { %v1472_v17 = vadd.f32 %v1470_v9, %v2516_v61 }
 0x15d   : > { %v1550_v39 = vpop.f32.mrf.mxu0  ;;  %v1591_v40 = vpop.f32.mrf.mxu1 }
 0x15e   : > { %v1551_v53 = vadd.f32 %v1550_v39, %v1509_v32 }
 0x15f   : > { %v1552_v41 = vpop.f32.mrf.mxu0  ;;  %v1593_v42 = vpop.f32.mrf.mxu1 }
 0x160   : > { %v1553_v54 = vadd.f32 %v1552_v41, %v1511_v34  ;;  %v1598_v57 = vadd.f32 %v1591_v40, %v1551_v53 }
 0x161   : > { %v1554_v43 = vpop.f32.mrf.mxu0  ;;  %v1595_v44 = vpop.f32.mrf.mxu1 }
 0x162   : > { %v1599_v0 = vadd.f32 %v1593_v42, %v1553_v54 }
 0x163   : > { %v1555_v45 = vpop.f32.mrf.mxu0  ;;  %v1596_v46 = vpop.f32.mrf.mxu1 }
 0x16d   : > { %v1634_v58 = vpop.f32.mrf.mxu0  ;;  %v1680_v59 = vpop.f32.mrf.mxu1 }
 0x16e   : > { %v1641_v1 = vadd.f32 %v1634_v58, %v1598_v57 }
 0x16f   : > { %v1636_v2 = vpop.f32.mrf.mxu0  ;;  %v1682_v3 = vpop.f32.mrf.mxu1 }
 0x170   : > { %v1687_v4 = vadd.f32 %v1680_v59, %v1641_v1  ;;  %v1642_v5 = vadd.f32 %v1636_v2, %v1599_v0 }
 0x171   : > { %v1638_v6 = vpop.f32.mrf.mxu0  ;;  %v1684_v7 = vpop.f32.mrf.mxu1 }
 0x172   : > { %v1689_v10 = vmul.f32 %v1687_v4, %v2507_v47  ;;  %v1688_v11 = vadd.f32 %v1682_v3, %v1642_v5 }
 0x173   : > { %v1639_v12 = vpop.f32.mrf.mxu0  ;;  %v1685_v13 = vpop.f32.mrf.mxu1 }
 0x174   : > { %v1691_v14 = vadd.f32 %v1689_v10, %v2514_v60  ;;  %v1690_v15 = vmul.f32 %v1688_v11, %v2509_v48 }
 0x176   : > { %v1692_v18 = vadd.f32 %v1690_v15, %v2516_v61  ;;  %v1693_v19 = vmax.f32 %v1471_v16, %v1691_v14 }
 0x178   : > { %v1694_v20 = vmax.f32 %v1472_v17, %v1692_v18 }
 0x17a   : > { %v1695_v21 = vmax.f32 %v1693_v19, %v1694_v20 }
 0x17c   : > { %v1696_v22 = vmax.f32 %v1695_v21, 0.0 }
 0x17e   : > { %1950 = vst [vmem:[%s2530_s25 + $0x8] sm:$0xff] %v1696_v22 }
 0x17f PF: > { %s15_s18 = sadd.s32 1, %s2030_s18  }
 0x180   : > { %p12_p4 = scmp.ge.s32.totalorder %s15_s18, 10  }
 0x182   :  { %14 = sbr.rel (!%p12_p4) target bundleno = 1 (0x1), region = 80 }

</bundles_post_ra>
